<compile_context>
chip_gen: v7x
topology: tpu7x:2x2x1
jax: 0.10.0
libtpu: 0.0.40
codegen_flags: <defaults>
</compile_context>

<pallas_src>
import functools

import numpy as np
import jax
import jax.numpy as jnp
from jax import lax
from jax.experimental import pallas as pl
from jax.experimental.pallas import tpu as pltpu

EPS = 1e-5          # both GroupNorms
PRELU_A = 0.25      # nn.PReLU() default slope (compile-time constant)


def _prelu(x, a):
    return jnp.where(x >= 0, x, a * x)


# ----------------------------------------------------------------------------
# Chip-dependent tiling / VMEM budgets
# ----------------------------------------------------------------------------
def _chip_config():
    """(min parallel grid steps, scoped-VMEM limit bytes) per TPU generation."""
    kind = ""
    try:
        kind = jax.devices()[0].device_kind.lower()
    except Exception:
        pass
    if "v7" in kind:                        # 2 TensorCores, 64 MiB VMEM
        return 2, 48 * 1024 * 1024
    if "v6" in kind or "v5" in kind:        # 1 TensorCore, 128 MiB VMEM
        return 1, 96 * 1024 * 1024
    return 1, 32 * 1024 * 1024              # unknown generation: conservative


def _pick_b_tile(B, G, T, N, Hr, H, min_grid, vmem_limit):
    """Largest per-block batch tile that fits the VMEM budget, keeps the
    recurrence carry within a vreg-pressure cap, and (when possible) leaves at
    least `min_grid` parallel grid steps (v7x: 2 TensorCores; v5e/v6e: 1)."""
    def fits(bt):
        Bs = bt * G
        R = T * Bs
        S2 = T * bt
        act = 2 * 2 * R * N * 4                       # in + out, double-buffered
        scr = R * 5 * Hr * 4                          # xg + hs scratch
        seg = 2 * 4 * (2 * R * Bs + 2 * R * S2)       # segment matrices (x2 buf)
        wts = 2 * 4 * (N * H + 3 * H + H * H + 2 * H * N + 4 * N + 4 * N * Hr
                       + 4 * Hr * Hr + 4 * Hr + Hr * N)
        vreg_ok = Bs * Hr * 4 * 6 <= 96 * 1024        # h,c carry + gate temps
        return (act + scr + seg + wts) <= vmem_limit and vreg_ok

    divisors = [d for d in range(1, B + 1) if B % d == 0]
    for need in (min_grid, 1):
        ok = [d for d in divisors if fits(d) and B // d >= need]
        if ok:
            return max(ok)
    return 1


def _segment_mats(b_tile, num_group, seq_len, feat):
    """Constant indicator/averaging matrices for the in-kernel segment
    reductions & broadcasts (executed as tiny matmuls on the idle MXU).
    Rows inside a block are ordered (t, b_local, g) — time-major.
    NOTE: quadratic in block rows; for very large blocks switch to
    reshape-based segment reductions instead."""
    G, T, N = num_group, seq_len, feat
    Bs = b_tile * G                      # sequences per block
    S2 = b_tile * T                      # (t, b) pairs per block
    R = T * Bs
    r = np.arange(R)
    seq_id = r % Bs                      # which (b, g) sequence a row belongs to
    bt_id = r // G                       # which (t, b) pair a row belongs to
    gn_red = (np.arange(Bs)[:, None] == seq_id[None, :]).astype(np.float32)
    gn_red /= float(T * N)               # -> per-sequence mean over (T, N)
    gn_bc = (seq_id[:, None] == np.arange(Bs)[None, :]).astype(np.float32)
    gavg = (np.arange(S2)[:, None] == bt_id[None, :]).astype(np.float32) / G
    grep = (bt_id[:, None] == np.arange(S2)[None, :]).astype(np.float32)
    return (jnp.asarray(gn_red), jnp.asarray(gn_bc),
            jnp.asarray(gavg), jnp.asarray(grep))


# ----------------------------------------------------------------------------
# Fused per-layer kernel: TAC + batched ProjLSTM + GroupNorm + residual.
# Block = (1, R, N) with R = T * b_tile * G rows ordered (t, b_local, g).
# ----------------------------------------------------------------------------
def gc_layer_kernel(x_ref, gn_red_ref, gn_bc_ref, gavg_ref, grep_ref,
                    w1f_ref, b1f_ref, w2_ref, b2_ref, w3a_ref, w3b_ref, b3_ref,
                    wih_ref, whh_ref, brnn_ref, wp_ref, bp_ref, lnw_ref,
                    lnb_ref, o_ref, xg_ref, hs_ref,
                    *, seq_len, rnn_hidden, mm_dtype):
    T, Hr, md = seq_len, rnn_hidden, mm_dtype
    x = x_ref[0]                                        # (R, N), rows (t, b, g)
    gn_red = gn_red_ref[...]                            # (Bs, R)  entries 1/(T*N)
    gn_bc = gn_bc_ref[...]                              # (R, Bs)  entries 1.0
    Bs = gn_red.shape[0]                                # sequences per block

    # ----------------------------- TAC --------------------------------------
    # GroupNorm(1, N) per (b, g): segment means via constant-matrix matmuls,
    # single pass with clamped variance (affine folded into w1f / b1f).
    row_s1 = jnp.sum(x, axis=1, keepdims=True)          # (R, 1)
    row_s2 = jnp.sum(x * x, axis=1, keepdims=True)
    mu_s = jnp.dot(gn_red, row_s1, preferred_element_type=jnp.float32)   # (Bs,1)
    m2_s = jnp.dot(gn_red, row_s2, preferred_element_type=jnp.float32)
    var_s = jnp.maximum(m2_s - mu_s * mu_s, 0.0)
    rs_s = lax.rsqrt(var_s + EPS)
    mu_r = jnp.dot(gn_bc, mu_s, preferred_element_type=jnp.float32)      # (R,1)
    rs_r = jnp.dot(gn_bc, rs_s, preferred_element_type=jnp.float32)
    xn = (x - mu_r) * rs_r

    # transform: ONE fused (R, N) @ (N, H) matmul for every (b, g, t).
    h1 = _prelu(jnp.dot(xn.astype(md), w1f_ref[...].astype(md),
                        preferred_element_type=jnp.float32) + b1f_ref[...],
                PRELU_A)                                 # (R, H)

    # group average over g for each (b, t) + Linear(H, H) + PReLU, all fused.
    hm = jnp.dot(gavg_ref[...], h1, preferred_element_type=jnp.float32)  # (S2,H)
    hm = _prelu(jnp.dot(hm.astype(md), w2_ref[...].astype(md),
                        preferred_element_type=jnp.float32) + b2_ref[...],
                PRELU_A)

    # concat([h1, mean]) @ W3 == h1 @ W3a + mean @ W3b; the mean term is
    # computed once per (b, t) and replicated to all groups by grep @ (.).
    hm3 = (jnp.dot(hm.astype(md), w3b_ref[...].astype(md),
                   preferred_element_type=jnp.float32) + b3_ref[...])    # (S2,N)
    hm3_full = jnp.dot(grep_ref[...], hm3, preferred_element_type=jnp.float32)
    h3 = jnp.dot(h1.astype(md), w3a_ref[...].astype(md),
                 preferred_element_type=jnp.float32)                     # (R,N)
    y = x + _prelu(h3 + hm3_full, PRELU_A)               # TAC output, (R, N)

    # ------------------ ProjRNN: batched LSTM over Bs sequences -------------
    # Gate pre-activations for ALL (sequence, timestep) pairs in one fused
    # matmul, stored time-major so the per-step read is a contiguous slice.
    whh = whh_ref[...].astype(md)
    xg_ref[...] = (jnp.dot(y.astype(md), wih_ref[...].astype(md),
                           preferred_element_type=jnp.float32) + brnn_ref[...])

    def step(t, carry):
        h, c = carry                                     # (Bs, Hr) f32
        r0 = pl.multiple_of(t * Bs, Bs)
        gates = (xg_ref[pl.ds(r0, Bs), :]
                 + jnp.dot(h.astype(md), whh,
                           preferred_element_type=jnp.float32))
        # TODO(synk): with Hr < 128 the per-gate lane slices below are
        # cross-lane extracts on the recurrence critical path; pad Hr to a
        # multiple of 128 for deployment shapes.
        i = jax.nn.sigmoid(gates[:, 0:Hr])
        f = jax.nn.sigmoid(gates[:, Hr:2 * Hr])
        g = jnp.tanh(gates[:, 2 * Hr:3 * Hr])
        o = jax.nn.sigmoid(gates[:, 3 * Hr:4 * Hr])
        c = f * c + i * g
        h = o * jnp.tanh(c)
        hs_ref[pl.ds(r0, Bs), :] = h                     # time-major, contiguous
        return h, c

    carry0 = (jnp.zeros((Bs, Hr), jnp.float32), jnp.zeros((Bs, Hr), jnp.float32))
    lax.fori_loop(0, T, step, carry0,
                  unroll=(True if T <= 16 else 8))       # bound vreg pressure

    # projection (ONE fused matmul) + GroupNorm(1, N) per sequence + residual.
    proj = (jnp.dot(hs_ref[...].astype(md), wp_ref[...].astype(md),
                    preferred_element_type=jnp.float32) + bp_ref[...])   # (R,N)
    p1 = jnp.sum(proj, axis=1, keepdims=True)
    p2 = jnp.sum(proj * proj, axis=1, keepdims=True)
    pmu_s = jnp.dot(gn_red, p1, preferred_element_type=jnp.float32)
    pm2_s = jnp.dot(gn_red, p2, preferred_element_type=jnp.float32)
    pvar_s = jnp.maximum(pm2_s - pmu_s * pmu_s, 0.0)
    prs_s = lax.rsqrt(pvar_s + EPS)
    pmu_r = jnp.dot(gn_bc, pmu_s, preferred_element_type=jnp.float32)
    prs_r = jnp.dot(gn_bc, prs_s, preferred_element_type=jnp.float32)
    normed = (proj - pmu_r) * prs_r * lnw_ref[...] + lnb_ref[...]

    o_ref[0] = y + normed                                # single full-block store


def _const_spec(a):
    nd = a.ndim
    return pl.BlockSpec(a.shape, lambda i, _nd=nd: (0,) * _nd)


def gc_layer_call(x_q, weights, seg_mats, seq_len, rnn_hidden, vmem_limit,
                  mm_dtype):
    Q, R, N = x_q.shape
    kernel = functools.partial(gc_layer_kernel, seq_len=seq_len,
                               rnn_hidden=rnn_hidden, mm_dtype=mm_dtype)
    consts = tuple(seg_mats) + tuple(weights)
    return pl.pallas_call(
        kernel,
        out_shape=jax.ShapeDtypeStruct((Q, R, N), jnp.float32),
        grid=(Q,),
        in_specs=[pl.BlockSpec((1, R, N), lambda i: (i, 0, 0))]
                 + [_const_spec(a) for a in consts],
        out_specs=pl.BlockSpec((1, R, N), lambda i: (i, 0, 0)),
        scratch_shapes=[pltpu.VMEM((R, 4 * rnn_hidden), jnp.float32),
                        pltpu.VMEM((R, rnn_hidden), jnp.float32)],
        compiler_params=pltpu.CompilerParams(
            dimension_semantics=("parallel",),
            vmem_limit_bytes=vmem_limit),
    )(x_q, *consts)


# ----------------------------------------------------------------------------
# GC_RNN wrapper (layout glue in plain JAX)
# ----------------------------------------------------------------------------
def gc_rnn_pallas(x, layers, num_group, mm_dtype=jnp.float32):
    B, dim, T = x.shape
    G = num_group
    N = dim // G
    Hr = layers[0]["rnn_hidden"]
    H = layers[0]["tac"]["w1t"].shape[1]

    min_grid, vmem_limit = _chip_config()
    bt = _pick_b_tile(B, G, T, N, Hr, H, min_grid, vmem_limit)
    Q = B // bt
    R = T * bt * G
    seg_mats = _segment_mats(bt, G, T, N)

    # (B, dim, T) -> (Q, R, N): per-block rows ordered (t, b_local, g) so the
    # per-timestep recurrence slice is contiguous; feature dim N on lanes.
    xq = (x.reshape(B, G, N, T).transpose(3, 0, 1, 2)          # (T, B, G, N)
           .reshape(T, Q, bt, G, N).transpose(1, 0, 2, 3, 4)   # (Q, T, bt, G, N)
           .reshape(Q, R, N))

    out = xq
    for p in layers:
        tp, rp = p["tac"], p["rnn"]
        # Fold the TAC GroupNorm affine into the first linear layer.
        w1f = tp["gn_w"].reshape(-1, 1) * tp["w1t"]            # (N, H)
        b1f = tp["b1"] + tp["gn_b"] @ tp["w1t"]                # (1, H)
        weights = (w1f, b1f, tp["w2t"], tp["b2"], tp["w3at"], tp["w3bt"],
                   tp["b3"], rp["wih_t"], rp["whh_t"], rp["b"], rp["wpt"],
                   rp["bp"], rp["ln_w"], rp["ln_b"])
        out = gc_layer_call(out, weights, seg_mats, T, p["rnn_hidden"],
                            vmem_limit, mm_dtype)

    y = (out.reshape(Q, T, bt, G, N).transpose(1, 0, 2, 3, 4)
            .reshape(T, B, G, N).transpose(1, 2, 3, 0).reshape(B, dim, T))
    return y


# ----------------------------------------------------------------------------
# Pure-JAX reference (same math, same param layout) for validation
# ----------------------------------------------------------------------------
def gc_rnn_ref(x, layers, num_group):
    B, dim, T = x.shape
    G = num_group
    N = dim // G
    out = x.reshape(B, G, N, T).transpose(0, 1, 3, 2)          # (B, G, T, N)
    for p in layers:
        tp = p["tac"]
        # TAC
        mu = jnp.mean(out, axis=(2, 3), keepdims=True)
        var = jnp.mean((out - mu) ** 2, axis=(2, 3), keepdims=True)
        xn = (out - mu) / jnp.sqrt(var + EPS)
        xn = xn * tp["gn_w"][None, None] + tp["gn_b"][None, None]
        h1 = _prelu(xn @ tp["w1t"] + tp["b1"], PRELU_A)        # (B, G, T, H)
        hm = jnp.mean(h1, axis=1)                               # (B, T, H)
        hm = _prelu(hm @ tp["w2t"] + tp["b2"], PRELU_A)
        og = _prelu(h1 @ tp["w3at"] + (hm @ tp["w3bt"])[:, None] + tp["b3"],
                    PRELU_A)
        out = out + og                                          # (B, G, T, N)

        # ProjRNN + GroupNorm + residual
        rp = p["rnn"]
        Hr = p["rnn_hidden"]
        r_in = out.reshape(B * G, T, N)
        xg = r_in @ rp["wih_t"] + rp["b"]                       # (BG, T, 4Hr)

        def step(carry, xg_t):
            h, c = carry
            g = xg_t + h @ rp["whh_t"]
            i = jax.nn.sigmoid(g[:, :Hr])
            f = jax.nn.sigmoid(g[:, Hr:2 * Hr])
            gg = jnp.tanh(g[:, 2 * Hr:3 * Hr])
            o = jax.nn.sigmoid(g[:, 3 * Hr:])
            c = f * c + i * gg
            h = o * jnp.tanh(c)
            return (h, c), h

        h0 = jnp.zeros((B * G, Hr), jnp.float32)
        c0 = jnp.zeros((B * G, Hr), jnp.float32)
        _, hs = lax.scan(step, (h0, c0), jnp.swapaxes(xg, 0, 1))
        hs = jnp.swapaxes(hs, 0, 1)                             # (BG, T, Hr)
        proj = hs @ rp["wpt"] + rp["bp"]                        # (BG, T, N)
        mu = jnp.mean(proj, axis=(1, 2), keepdims=True)
        var = jnp.mean((proj - mu) ** 2, axis=(1, 2), keepdims=True)
        normed = (proj - mu) / jnp.sqrt(var + EPS)
        normed = normed * rp["ln_w"][None] + rp["ln_b"][None]
        out = (r_in + normed).reshape(B, G, T, N)
    return out.transpose(0, 1, 3, 2).reshape(B, dim, T)


# ----------------------------------------------------------------------------
# Deterministic parameter construction
# ----------------------------------------------------------------------------
def make_params(key, input_size, hidden_size, num_group, num_layers):
    N = input_size // num_group
    H = hidden_size * 3 // num_group          # TAC hidden
    Hr = hidden_size // num_group             # RNN hidden
    layers = []
    for _ in range(num_layers):
        keys = jax.random.split(key, 16)
        key = keys[-1]
        nrm = lambda k, s, sc=0.1: sc * jax.random.normal(k, s, jnp.float32)
        tac = dict(
            gn_w=1.0 + nrm(keys[0], (1, N)), gn_b=nrm(keys[1], (1, N)),
            w1t=nrm(keys[2], (N, H)), b1=nrm(keys[3], (1, H), 0.05),
            w2t=nrm(keys[4], (H, H)), b2=nrm(keys[5], (1, H), 0.05),
            w3at=nrm(keys[6], (H, N)), w3bt=nrm(keys[7], (H, N)),
            b3=nrm(keys[8], (1, N), 0.05),
        )
        rnn = dict(
            wih_t=nrm(keys[9], (N, 4 * Hr)), whh_t=nrm(keys[10], (Hr, 4 * Hr)),
            b=nrm(keys[11], (1, 4 * Hr), 0.05),        # b_ih + b_hh combined
            wpt=nrm(keys[12], (Hr, N)), bp=nrm(keys[13], (1, N), 0.05),
            ln_w=1.0 + nrm(keys[14], (1, N)), ln_b=nrm(keys[15], (1, N)),
        )
        layers.append(dict(tac=tac, rnn=rnn, rnn_hidden=Hr))
    return layers


if __name__ == "__main__":
    B, input_size, hidden_size, seq_len = 2, 16, 32, 8
    num_group, num_layers = 2, 1

    key = jax.random.PRNGKey(0)
    kp, kx = jax.random.split(key)
    layers = make_params(kp, input_size, hidden_size, num_group, num_layers)
    x = jax.random.normal(kx, (B, input_size, seq_len), jnp.float32)

    y = gc_rnn_pallas(x, layers, num_group)           # f32 MXU path (exact)
    y = jax.block_until_ready(y)

    y_ref = gc_rnn_ref(x, layers, num_group)
    assert y.shape == (B, input_size, seq_len)
    max_err = float(jnp.max(jnp.abs(y - y_ref)))
    if not jnp.allclose(y, y_ref, rtol=2e-3, atol=2e-3):
        raise AssertionError(f"Pallas output mismatch, max abs err = {max_err}")
    print("KERNEL_OK")
</pallas_src>

<mosaic_0001>
module attributes {stable_mosaic.version = 11 : i64} {
  func.func @gc_layer_kernel(%arg0: i32, %arg1: memref<1x32x8xf32, #tpu.memory_space<vmem>>, %arg2: memref<4x32xf32, #tpu.memory_space<vmem>>, %arg3: memref<32x4xf32, #tpu.memory_space<vmem>>, %arg4: memref<16x32xf32, #tpu.memory_space<vmem>>, %arg5: memref<32x16xf32, #tpu.memory_space<vmem>>, %arg6: memref<8x48xf32, #tpu.memory_space<vmem>>, %arg7: memref<1x48xf32, #tpu.memory_space<vmem>>, %arg8: memref<48x48xf32, #tpu.memory_space<vmem>>, %arg9: memref<1x48xf32, #tpu.memory_space<vmem>>, %arg10: memref<48x8xf32, #tpu.memory_space<vmem>>, %arg11: memref<48x8xf32, #tpu.memory_space<vmem>>, %arg12: memref<1x8xf32, #tpu.memory_space<vmem>>, %arg13: memref<8x64xf32, #tpu.memory_space<vmem>>, %arg14: memref<16x64xf32, #tpu.memory_space<vmem>>, %arg15: memref<1x64xf32, #tpu.memory_space<vmem>>, %arg16: memref<16x8xf32, #tpu.memory_space<vmem>>, %arg17: memref<1x8xf32, #tpu.memory_space<vmem>>, %arg18: memref<1x8xf32, #tpu.memory_space<vmem>>, %arg19: memref<1x8xf32, #tpu.memory_space<vmem>>, %arg20: memref<1x32x8xf32, #tpu.memory_space<vmem>>, %arg21: memref<32x64xf32, #tpu.memory_space<vmem>>, %arg22: memref<32x16xf32, #tpu.memory_space<vmem>>) attributes {dimension_semantics = [#tpu.dimension_semantics<parallel>], iteration_bounds = array<i64: 1>, scalar_prefetch = 0 : i64, scratch_operands = 2 : i64, tpu.core_type = #tpu.core_type<tc>, window_params = [{transform_indices = @transform_0, window_bounds = array<i64: 1, 32, 8>}, {pipeline_mode = #tpu.pipeline_mode<synchronous>, transform_indices = @transform_1, window_bounds = array<i64: 4, 32>}, {pipeline_mode = #tpu.pipeline_mode<synchronous>, transform_indices = @transform_2, window_bounds = array<i64: 32, 4>}, {pipeline_mode = #tpu.pipeline_mode<synchronous>, transform_indices = @transform_3, window_bounds = array<i64: 16, 32>}, {pipeline_mode = #tpu.pipeline_mode<synchronous>, transform_indices = @transform_4, window_bounds = array<i64: 32, 16>}, {pipeline_mode = #tpu.pipeline_mode<synchronous>, transform_indices = @transform_5, window_bounds = array<i64: 8, 48>}, {pipeline_mode = #tpu.pipeline_mode<synchronous>, transform_indices = @transform_6, window_bounds = array<i64: 1, 48>}, {pipeline_mode = #tpu.pipeline_mode<synchronous>, transform_indices = @transform_7, window_bounds = array<i64: 48, 48>}, {pipeline_mode = #tpu.pipeline_mode<synchronous>, transform_indices = @transform_8, window_bounds = array<i64: 1, 48>}, {pipeline_mode = #tpu.pipeline_mode<synchronous>, transform_indices = @transform_9, window_bounds = array<i64: 48, 8>}, {pipeline_mode = #tpu.pipeline_mode<synchronous>, transform_indices = @transform_10, window_bounds = array<i64: 48, 8>}, {pipeline_mode = #tpu.pipeline_mode<synchronous>, transform_indices = @transform_11, window_bounds = array<i64: 1, 8>}, {pipeline_mode = #tpu.pipeline_mode<synchronous>, transform_indices = @transform_12, window_bounds = array<i64: 8, 64>}, {pipeline_mode = #tpu.pipeline_mode<synchronous>, transform_indices = @transform_13, window_bounds = array<i64: 16, 64>}, {pipeline_mode = #tpu.pipeline_mode<synchronous>, transform_indices = @transform_14, window_bounds = array<i64: 1, 64>}, {pipeline_mode = #tpu.pipeline_mode<synchronous>, transform_indices = @transform_15, window_bounds = array<i64: 16, 8>}, {pipeline_mode = #tpu.pipeline_mode<synchronous>, transform_indices = @transform_16, window_bounds = array<i64: 1, 8>}, {pipeline_mode = #tpu.pipeline_mode<synchronous>, transform_indices = @transform_17, window_bounds = array<i64: 1, 8>}, {pipeline_mode = #tpu.pipeline_mode<synchronous>, transform_indices = @transform_18, window_bounds = array<i64: 1, 8>}, {transform_indices = @transform_19, window_bounds = array<i64: 1, 32, 8>}]} {
    %c0 = arith.constant 0 : index
    %c0_0 = arith.constant 0 : index
    %c0_1 = arith.constant 0 : index
    %0 = vector.load %arg1[%c0, %c0_0, %c0_1] : memref<1x32x8xf32, #tpu.memory_space<vmem>>, vector<1x32x8xf32>
    %1 = vector.shape_cast %0 : vector<1x32x8xf32> to vector<32x8xf32>
    %c0_2 = arith.constant 0 : index
    %c0_3 = arith.constant 0 : index
    %2 = vector.load %arg2[%c0_2, %c0_3] : memref<4x32xf32, #tpu.memory_space<vmem>>, vector<4x32xf32>
    %c0_4 = arith.constant 0 : index
    %c0_5 = arith.constant 0 : index
    %3 = vector.load %arg3[%c0_4, %c0_5] : memref<32x4xf32, #tpu.memory_space<vmem>>, vector<32x4xf32>
    %cst = arith.constant dense<0.000000e+00> : vector<32xf32>
    %4 = vector.multi_reduction <add>, %1, %cst [1] : vector<32x8xf32> to vector<32xf32>
    %5 = vector.shape_cast %4 : vector<32xf32> to vector<32x1xf32>
    %6 = arith.mulf %1, %1 : vector<32x8xf32>
    %cst_6 = arith.constant dense<0.000000e+00> : vector<32xf32>
    %7 = vector.multi_reduction <add>, %6, %cst_6 [1] : vector<32x8xf32> to vector<32xf32>
    %8 = vector.shape_cast %7 : vector<32xf32> to vector<32x1xf32>
    %cst_7 = arith.constant dense<0.000000e+00> : vector<4x1xf32>
    %9 = tpu.matmul %2, %5, %cst_7 {dimension_numbers = #tpu.dot_dimension_numbers<[1], [0], [0], [1], [0, 0, 1, 1], [], []>} : vector<4x32xf32>, vector<32x1xf32>, vector<4x1xf32> -> vector<4x1xf32>
    %cst_8 = arith.constant dense<0.000000e+00> : vector<4x1xf32>
    %10 = tpu.matmul %2, %8, %cst_8 {dimension_numbers = #tpu.dot_dimension_numbers<[1], [0], [0], [1], [0, 0, 1, 1], [], []>} : vector<4x32xf32>, vector<32x1xf32>, vector<4x1xf32> -> vector<4x1xf32>
    %11 = arith.mulf %9, %9 : vector<4x1xf32>
    %12 = arith.subf %10, %11 : vector<4x1xf32>
    %cst_9 = arith.constant 0.000000e+00 : f32
    %13 = vector.broadcast %cst_9 : f32 to vector<4x1xf32>
    %14 = arith.maximumf %12, %13 : vector<4x1xf32>
    %cst_10 = arith.constant 9.99999974E-6 : f32
    %15 = vector.broadcast %cst_10 : f32 to vector<4x1xf32>
    %16 = arith.addf %14, %15 : vector<4x1xf32>
    %17 = math.rsqrt %16 : vector<4x1xf32>
    %cst_11 = arith.constant dense<0.000000e+00> : vector<32x1xf32>
    %18 = tpu.matmul %3, %9, %cst_11 {dimension_numbers = #tpu.dot_dimension_numbers<[1], [0], [0], [1], [0, 0, 1, 1], [], []>} : vector<32x4xf32>, vector<4x1xf32>, vector<32x1xf32> -> vector<32x1xf32>
    %cst_12 = arith.constant dense<0.000000e+00> : vector<32x1xf32>
    %19 = tpu.matmul %3, %17, %cst_12 {dimension_numbers = #tpu.dot_dimension_numbers<[1], [0], [0], [1], [0, 0, 1, 1], [], []>} : vector<32x4xf32>, vector<4x1xf32>, vector<32x1xf32> -> vector<32x1xf32>
    %20 = vector.broadcast %18 : vector<32x1xf32> to vector<32x8xf32>
    %21 = arith.subf %1, %20 : vector<32x8xf32>
    %22 = vector.broadcast %19 : vector<32x1xf32> to vector<32x8xf32>
    %23 = arith.mulf %21, %22 : vector<32x8xf32>
    %c0_13 = arith.constant 0 : index
    %c0_14 = arith.constant 0 : index
    %24 = vector.load %arg6[%c0_13, %c0_14] : memref<8x48xf32, #tpu.memory_space<vmem>>, vector<8x48xf32>
    %cst_15 = arith.constant dense<0.000000e+00> : vector<32x48xf32>
    %25 = tpu.matmul %23, %24, %cst_15 {dimension_numbers = #tpu.dot_dimension_numbers<[1], [0], [0], [1], [0, 0, 1, 1], [], []>} : vector<32x8xf32>, vector<8x48xf32>, vector<32x48xf32> -> vector<32x48xf32>
    %c0_16 = arith.constant 0 : index
    %c0_17 = arith.constant 0 : index
    %26 = vector.load %arg7[%c0_16, %c0_17] : memref<1x48xf32, #tpu.memory_space<vmem>>, vector<1x48xf32>
    %27 = vector.broadcast %26 : vector<1x48xf32> to vector<32x48xf32>
    %28 = arith.addf %25, %27 : vector<32x48xf32>
    %cst_18 = arith.constant 0.000000e+00 : f32
    %29 = vector.broadcast %cst_18 : f32 to vector<32x48xf32>
    %30 = arith.cmpf oge, %28, %29 : vector<32x48xf32>
    %cst_19 = arith.constant 2.500000e-01 : f32
    %31 = vector.broadcast %cst_19 : f32 to vector<32x48xf32>
    %32 = arith.mulf %31, %28 : vector<32x48xf32>
    %33 = arith.select %30, %28, %32 : vector<32x48xi1>, vector<32x48xf32>
    %c0_20 = arith.constant 0 : index
    %c0_21 = arith.constant 0 : index
    %34 = vector.load %arg4[%c0_20, %c0_21] : memref<16x32xf32, #tpu.memory_space<vmem>>, vector<16x32xf32>
    %cst_22 = arith.constant dense<0.000000e+00> : vector<16x48xf32>
    %35 = tpu.matmul %34, %33, %cst_22 {dimension_numbers = #tpu.dot_dimension_numbers<[1], [0], [0], [1], [0, 0, 1, 1], [], []>} : vector<16x32xf32>, vector<32x48xf32>, vector<16x48xf32> -> vector<16x48xf32>
    %c0_23 = arith.constant 0 : index
    %c0_24 = arith.constant 0 : index
    %36 = vector.load %arg8[%c0_23, %c0_24] : memref<48x48xf32, #tpu.memory_space<vmem>>, vector<48x48xf32>
    %cst_25 = arith.constant dense<0.000000e+00> : vector<16x48xf32>
    %37 = tpu.matmul %35, %36, %cst_25 {dimension_numbers = #tpu.dot_dimension_numbers<[1], [0], [0], [1], [0, 0, 1, 1], [], []>} : vector<16x48xf32>, vector<48x48xf32>, vector<16x48xf32> -> vector<16x48xf32>
    %c0_26 = arith.constant 0 : index
    %c0_27 = arith.constant 0 : index
    %38 = vector.load %arg9[%c0_26, %c0_27] : memref<1x48xf32, #tpu.memory_space<vmem>>, vector<1x48xf32>
    %39 = vector.broadcast %38 : vector<1x48xf32> to vector<16x48xf32>
    %40 = arith.addf %37, %39 : vector<16x48xf32>
    %cst_28 = arith.constant 0.000000e+00 : f32
    %41 = vector.broadcast %cst_28 : f32 to vector<16x48xf32>
    %42 = arith.cmpf oge, %40, %41 : vector<16x48xf32>
    %cst_29 = arith.constant 2.500000e-01 : f32
    %43 = vector.broadcast %cst_29 : f32 to vector<16x48xf32>
    %44 = arith.mulf %43, %40 : vector<16x48xf32>
    %45 = arith.select %42, %40, %44 : vector<16x48xi1>, vector<16x48xf32>
    %c0_30 = arith.constant 0 : index
    %c0_31 = arith.constant 0 : index
    %46 = vector.load %arg11[%c0_30, %c0_31] : memref<48x8xf32, #tpu.memory_space<vmem>>, vector<48x8xf32>
    %cst_32 = arith.constant dense<0.000000e+00> : vector<16x8xf32>
    %47 = tpu.matmul %45, %46, %cst_32 {dimension_numbers = #tpu.dot_dimension_numbers<[1], [0], [0], [1], [0, 0, 1, 1], [], []>} : vector<16x48xf32>, vector<48x8xf32>, vector<16x8xf32> -> vector<16x8xf32>
    %c0_33 = arith.constant 0 : index
    %c0_34 = arith.constant 0 : index
    %48 = vector.load %arg12[%c0_33, %c0_34] : memref<1x8xf32, #tpu.memory_space<vmem>>, vector<1x8xf32>
    %49 = vector.broadcast %48 : vector<1x8xf32> to vector<16x8xf32>
    %50 = arith.addf %47, %49 : vector<16x8xf32>
    %c0_35 = arith.constant 0 : index
    %c0_36 = arith.constant 0 : index
    %51 = vector.load %arg5[%c0_35, %c0_36] : memref<32x16xf32, #tpu.memory_space<vmem>>, vector<32x16xf32>
    %cst_37 = arith.constant dense<0.000000e+00> : vector<32x8xf32>
    %52 = tpu.matmul %51, %50, %cst_37 {dimension_numbers = #tpu.dot_dimension_numbers<[1], [0], [0], [1], [0, 0, 1, 1], [], []>} : vector<32x16xf32>, vector<16x8xf32>, vector<32x8xf32> -> vector<32x8xf32>
    %c0_38 = arith.constant 0 : index
    %c0_39 = arith.constant 0 : index
    %53 = vector.load %arg10[%c0_38, %c0_39] : memref<48x8xf32, #tpu.memory_space<vmem>>, vector<48x8xf32>
    %cst_40 = arith.constant dense<0.000000e+00> : vector<32x8xf32>
    %54 = tpu.matmul %33, %53, %cst_40 {dimension_numbers = #tpu.dot_dimension_numbers<[1], [0], [0], [1], [0, 0, 1, 1], [], []>} : vector<32x48xf32>, vector<48x8xf32>, vector<32x8xf32> -> vector<32x8xf32>
    %55 = arith.addf %54, %52 : vector<32x8xf32>
    %cst_41 = arith.constant 0.000000e+00 : f32
    %56 = vector.broadcast %cst_41 : f32 to vector<32x8xf32>
    %57 = arith.cmpf oge, %55, %56 : vector<32x8xf32>
    %cst_42 = arith.constant 2.500000e-01 : f32
    %58 = vector.broadcast %cst_42 : f32 to vector<32x8xf32>
    %59 = arith.mulf %58, %55 : vector<32x8xf32>
    %60 = arith.select %57, %55, %59 : vector<32x8xi1>, vector<32x8xf32>
    %61 = arith.addf %1, %60 : vector<32x8xf32>
    %c0_43 = arith.constant 0 : index
    %c0_44 = arith.constant 0 : index
    %62 = vector.load %arg14[%c0_43, %c0_44] : memref<16x64xf32, #tpu.memory_space<vmem>>, vector<16x64xf32>
    %c0_45 = arith.constant 0 : index
    %c0_46 = arith.constant 0 : index
    %63 = vector.load %arg13[%c0_45, %c0_46] : memref<8x64xf32, #tpu.memory_space<vmem>>, vector<8x64xf32>
    %cst_47 = arith.constant dense<0.000000e+00> : vector<32x64xf32>
    %64 = tpu.matmul %61, %63, %cst_47 {dimension_numbers = #tpu.dot_dimension_numbers<[1], [0], [0], [1], [0, 0, 1, 1], [], []>} : vector<32x8xf32>, vector<8x64xf32>, vector<32x64xf32> -> vector<32x64xf32>
    %c0_48 = arith.constant 0 : index
    %c0_49 = arith.constant 0 : index
    %65 = vector.load %arg15[%c0_48, %c0_49] : memref<1x64xf32, #tpu.memory_space<vmem>>, vector<1x64xf32>
    %66 = vector.broadcast %65 : vector<1x64xf32> to vector<32x64xf32>
    %67 = arith.addf %64, %66 : vector<32x64xf32>
    %c0_50 = arith.constant 0 : index
    %c0_51 = arith.constant 0 : index
    %68 = vector.load %arg21[%c0_50, %c0_51] : memref<32x64xf32, #tpu.memory_space<vmem>>, vector<32x64xf32>
    tpu.vector_store %arg21[%c0_50, %c0_51], %67 {strides = array<i32>} : memref<32x64xf32, #tpu.memory_space<vmem>>, vector<32x64xf32>,
    %cst_52 = arith.constant 0.000000e+00 : f32
    %69 = vector.broadcast %cst_52 : f32 to vector<4x16xf32>
    %cst_53 = arith.constant 0.000000e+00 : f32
    %70 = vector.broadcast %cst_53 : f32 to vector<4x16xf32>
    %c0_i32 = arith.constant 0 : i32
    %c4_i32 = arith.constant 4 : i32
    %71 = arith.muli %c0_i32, %c4_i32 : i32
    %72 = tpu.assume_multiple %71, 4 : i32
    %73 = arith.index_cast %72 : i32 to index
    %c0_54 = arith.constant 0 : index
    %74 = vector.load %arg21[%73, %c0_54] : memref<32x64xf32, #tpu.memory_space<vmem>>, vector<4x64xf32>
    %cst_55 = arith.constant dense<0.000000e+00> : vector<4x64xf32>
    %75 = tpu.matmul %69, %62, %cst_55 {dimension_numbers = #tpu.dot_dimension_numbers<[1], [0], [0], [1], [0, 0, 1, 1], [], []>} : vector<4x16xf32>, vector<16x64xf32>, vector<4x64xf32> -> vector<4x64xf32>
    %76 = arith.addf %74, %75 : vector<4x64xf32>
    %77 = vector.extract_strided_slice %76 {offsets = [0, 0], sizes = [4, 16], strides = [1, 1]} : vector<4x64xf32> to vector<4x16xf32>
    %78 = arith.negf %77 : vector<4x16xf32>
    %79 = math.exp %78 : vector<4x16xf32>
    %cst_56 = arith.constant 1.000000e+00 : f32
    %80 = vector.broadcast %cst_56 : f32 to vector<4x16xf32>
    %81 = arith.addf %80, %79 : vector<4x16xf32>
    %82 = arith.divf %80, %81 : vector<4x16xf32>
    %83 = vector.extract_strided_slice %76 {offsets = [0, 16], sizes = [4, 16], strides = [1, 1]} : vector<4x64xf32> to vector<4x16xf32>
    %84 = arith.negf %83 : vector<4x16xf32>
    %85 = math.exp %84 : vector<4x16xf32>
    %cst_57 = arith.constant 1.000000e+00 : f32
    %86 = vector.broadcast %cst_57 : f32 to vector<4x16xf32>
    %87 = arith.addf %86, %85 : vector<4x16xf32>
    %88 = arith.divf %86, %87 : vector<4x16xf32>
    %89 = vector.extract_strided_slice %76 {offsets = [0, 32], sizes = [4, 16], strides = [1, 1]} : vector<4x64xf32> to vector<4x16xf32>
    %90 = math.tanh %89 : vector<4x16xf32>
    %91 = vector.extract_strided_slice %76 {offsets = [0, 48], sizes = [4, 16], strides = [1, 1]} : vector<4x64xf32> to vector<4x16xf32>
    %92 = arith.negf %91 : vector<4x16xf32>
    %93 = math.exp %92 : vector<4x16xf32>
    %cst_58 = arith.constant 1.000000e+00 : f32
    %94 = vector.broadcast %cst_58 : f32 to vector<4x16xf32>
    %95 = arith.addf %94, %93 : vector<4x16xf32>
    %96 = arith.divf %94, %95 : vector<4x16xf32>
    %97 = arith.mulf %88, %70 : vector<4x16xf32>
    %98 = arith.mulf %82, %90 : vector<4x16xf32>
    %99 = arith.addf %97, %98 : vector<4x16xf32>
    %100 = math.tanh %99 : vector<4x16xf32>
    %101 = arith.mulf %96, %100 : vector<4x16xf32>
    %102 = arith.index_cast %72 : i32 to index
    %c0_59 = arith.constant 0 : index
    %103 = vector.load %arg22[%102, %c0_59] : memref<32x16xf32, #tpu.memory_space<vmem>>, vector<4x16xf32>
    tpu.vector_store %arg22[%102, %c0_59], %101 {strides = array<i32>} : memref<32x16xf32, #tpu.memory_space<vmem>>, vector<4x16xf32>,
    %c1_i32 = arith.constant 1 : i32
    %c4_i32_60 = arith.constant 4 : i32
    %104 = arith.muli %c1_i32, %c4_i32_60 : i32
    %105 = tpu.assume_multiple %104, 4 : i32
    %106 = arith.index_cast %105 : i32 to index
    %c0_61 = arith.constant 0 : index
    %107 = vector.load %arg21[%106, %c0_61] : memref<32x64xf32, #tpu.memory_space<vmem>>, vector<4x64xf32>
    %cst_62 = arith.constant dense<0.000000e+00> : vector<4x64xf32>
    %108 = tpu.matmul %101, %62, %cst_62 {dimension_numbers = #tpu.dot_dimension_numbers<[1], [0], [0], [1], [0, 0, 1, 1], [], []>} : vector<4x16xf32>, vector<16x64xf32>, vector<4x64xf32> -> vector<4x64xf32>
    %109 = arith.addf %107, %108 : vector<4x64xf32>
    %110 = vector.extract_strided_slice %109 {offsets = [0, 0], sizes = [4, 16], strides = [1, 1]} : vector<4x64xf32> to vector<4x16xf32>
    %111 = arith.negf %110 : vector<4x16xf32>
    %112 = math.exp %111 : vector<4x16xf32>
    %cst_63 = arith.constant 1.000000e+00 : f32
    %113 = vector.broadcast %cst_63 : f32 to vector<4x16xf32>
    %114 = arith.addf %113, %112 : vector<4x16xf32>
    %115 = arith.divf %113, %114 : vector<4x16xf32>
    %116 = vector.extract_strided_slice %109 {offsets = [0, 16], sizes = [4, 16], strides = [1, 1]} : vector<4x64xf32> to vector<4x16xf32>
    %117 = arith.negf %116 : vector<4x16xf32>
    %118 = math.exp %117 : vector<4x16xf32>
    %cst_64 = arith.constant 1.000000e+00 : f32
    %119 = vector.broadcast %cst_64 : f32 to vector<4x16xf32>
    %120 = arith.addf %119, %118 : vector<4x16xf32>
    %121 = arith.divf %119, %120 : vector<4x16xf32>
    %122 = vector.extract_strided_slice %109 {offsets = [0, 32], sizes = [4, 16], strides = [1, 1]} : vector<4x64xf32> to vector<4x16xf32>
    %123 = math.tanh %122 : vector<4x16xf32>
    %124 = vector.extract_strided_slice %109 {offsets = [0, 48], sizes = [4, 16], strides = [1, 1]} : vector<4x64xf32> to vector<4x16xf32>
    %125 = arith.negf %124 : vector<4x16xf32>
    %126 = math.exp %125 : vector<4x16xf32>
    %cst_65 = arith.constant 1.000000e+00 : f32
    %127 = vector.broadcast %cst_65 : f32 to vector<4x16xf32>
    %128 = arith.addf %127, %126 : vector<4x16xf32>
    %129 = arith.divf %127, %128 : vector<4x16xf32>
    %130 = arith.mulf %121, %99 : vector<4x16xf32>
    %131 = arith.mulf %115, %123 : vector<4x16xf32>
    %132 = arith.addf %130, %131 : vector<4x16xf32>
    %133 = math.tanh %132 : vector<4x16xf32>
    %134 = arith.mulf %129, %133 : vector<4x16xf32>
    %135 = arith.index_cast %105 : i32 to index
    %c0_66 = arith.constant 0 : index
    %136 = vector.load %arg22[%135, %c0_66] : memref<32x16xf32, #tpu.memory_space<vmem>>, vector<4x16xf32>
    tpu.vector_store %arg22[%135, %c0_66], %134 {strides = array<i32>} : memref<32x16xf32, #tpu.memory_space<vmem>>, vector<4x16xf32>,
    %c2_i32 = arith.constant 2 : i32
    %c4_i32_67 = arith.constant 4 : i32
    %137 = arith.muli %c2_i32, %c4_i32_67 : i32
    %138 = tpu.assume_multiple %137, 4 : i32
    %139 = arith.index_cast %138 : i32 to index
    %c0_68 = arith.constant 0 : index
    %140 = vector.load %arg21[%139, %c0_68] : memref<32x64xf32, #tpu.memory_space<vmem>>, vector<4x64xf32>
    %cst_69 = arith.constant dense<0.000000e+00> : vector<4x64xf32>
    %141 = tpu.matmul %134, %62, %cst_69 {dimension_numbers = #tpu.dot_dimension_numbers<[1], [0], [0], [1], [0, 0, 1, 1], [], []>} : vector<4x16xf32>, vector<16x64xf32>, vector<4x64xf32> -> vector<4x64xf32>
    %142 = arith.addf %140, %141 : vector<4x64xf32>
    %143 = vector.extract_strided_slice %142 {offsets = [0, 0], sizes = [4, 16], strides = [1, 1]} : vector<4x64xf32> to vector<4x16xf32>
    %144 = arith.negf %143 : vector<4x16xf32>
    %145 = math.exp %144 : vector<4x16xf32>
    %cst_70 = arith.constant 1.000000e+00 : f32
    %146 = vector.broadcast %cst_70 : f32 to vector<4x16xf32>
    %147 = arith.addf %146, %145 : vector<4x16xf32>
    %148 = arith.divf %146, %147 : vector<4x16xf32>
    %149 = vector.extract_strided_slice %142 {offsets = [0, 16], sizes = [4, 16], strides = [1, 1]} : vector<4x64xf32> to vector<4x16xf32>
    %150 = arith.negf %149 : vector<4x16xf32>
    %151 = math.exp %150 : vector<4x16xf32>
    %cst_71 = arith.constant 1.000000e+00 : f32
    %152 = vector.broadcast %cst_71 : f32 to vector<4x16xf32>
    %153 = arith.addf %152, %151 : vector<4x16xf32>
    %154 = arith.divf %152, %153 : vector<4x16xf32>
    %155 = vector.extract_strided_slice %142 {offsets = [0, 32], sizes = [4, 16], strides = [1, 1]} : vector<4x64xf32> to vector<4x16xf32>
    %156 = math.tanh %155 : vector<4x16xf32>
    %157 = vector.extract_strided_slice %142 {offsets = [0, 48], sizes = [4, 16], strides = [1, 1]} : vector<4x64xf32> to vector<4x16xf32>
    %158 = arith.negf %157 : vector<4x16xf32>
    %159 = math.exp %158 : vector<4x16xf32>
    %cst_72 = arith.constant 1.000000e+00 : f32
    %160 = vector.broadcast %cst_72 : f32 to vector<4x16xf32>
    %161 = arith.addf %160, %159 : vector<4x16xf32>
    %162 = arith.divf %160, %161 : vector<4x16xf32>
    %163 = arith.mulf %154, %132 : vector<4x16xf32>
    %164 = arith.mulf %148, %156 : vector<4x16xf32>
    %165 = arith.addf %163, %164 : vector<4x16xf32>
    %166 = math.tanh %165 : vector<4x16xf32>
    %167 = arith.mulf %162, %166 : vector<4x16xf32>
    %168 = arith.index_cast %138 : i32 to index
    %c0_73 = arith.constant 0 : index
    %169 = vector.load %arg22[%168, %c0_73] : memref<32x16xf32, #tpu.memory_space<vmem>>, vector<4x16xf32>
    tpu.vector_store %arg22[%168, %c0_73], %167 {strides = array<i32>} : memref<32x16xf32, #tpu.memory_space<vmem>>, vector<4x16xf32>,
    %c3_i32 = arith.constant 3 : i32
    %c4_i32_74 = arith.constant 4 : i32
    %170 = arith.muli %c3_i32, %c4_i32_74 : i32
    %171 = tpu.assume_multiple %170, 4 : i32
    %172 = arith.index_cast %171 : i32 to index
    %c0_75 = arith.constant 0 : index
    %173 = vector.load %arg21[%172, %c0_75] : memref<32x64xf32, #tpu.memory_space<vmem>>, vector<4x64xf32>
    %cst_76 = arith.constant dense<0.000000e+00> : vector<4x64xf32>
    %174 = tpu.matmul %167, %62, %cst_76 {dimension_numbers = #tpu.dot_dimension_numbers<[1], [0], [0], [1], [0, 0, 1, 1], [], []>} : vector<4x16xf32>, vector<16x64xf32>, vector<4x64xf32> -> vector<4x64xf32>
    %175 = arith.addf %173, %174 : vector<4x64xf32>
    %176 = vector.extract_strided_slice %175 {offsets = [0, 0], sizes = [4, 16], strides = [1, 1]} : vector<4x64xf32> to vector<4x16xf32>
    %177 = arith.negf %176 : vector<4x16xf32>
    %178 = math.exp %177 : vector<4x16xf32>
    %cst_77 = arith.constant 1.000000e+00 : f32
    %179 = vector.broadcast %cst_77 : f32 to vector<4x16xf32>
    %180 = arith.addf %179, %178 : vector<4x16xf32>
    %181 = arith.divf %179, %180 : vector<4x16xf32>
    %182 = vector.extract_strided_slice %175 {offsets = [0, 16], sizes = [4, 16], strides = [1, 1]} : vector<4x64xf32> to vector<4x16xf32>
    %183 = arith.negf %182 : vector<4x16xf32>
    %184 = math.exp %183 : vector<4x16xf32>
    %cst_78 = arith.constant 1.000000e+00 : f32
    %185 = vector.broadcast %cst_78 : f32 to vector<4x16xf32>
    %186 = arith.addf %185, %184 : vector<4x16xf32>
    %187 = arith.divf %185, %186 : vector<4x16xf32>
    %188 = vector.extract_strided_slice %175 {offsets = [0, 32], sizes = [4, 16], strides = [1, 1]} : vector<4x64xf32> to vector<4x16xf32>
    %189 = math.tanh %188 : vector<4x16xf32>
    %190 = vector.extract_strided_slice %175 {offsets = [0, 48], sizes = [4, 16], strides = [1, 1]} : vector<4x64xf32> to vector<4x16xf32>
    %191 = arith.negf %190 : vector<4x16xf32>
    %192 = math.exp %191 : vector<4x16xf32>
    %cst_79 = arith.constant 1.000000e+00 : f32
    %193 = vector.broadcast %cst_79 : f32 to vector<4x16xf32>
    %194 = arith.addf %193, %192 : vector<4x16xf32>
    %195 = arith.divf %193, %194 : vector<4x16xf32>
    %196 = arith.mulf %187, %165 : vector<4x16xf32>
    %197 = arith.mulf %181, %189 : vector<4x16xf32>
    %198 = arith.addf %196, %197 : vector<4x16xf32>
    %199 = math.tanh %198 : vector<4x16xf32>
    %200 = arith.mulf %195, %199 : vector<4x16xf32>
    %201 = arith.index_cast %171 : i32 to index
    %c0_80 = arith.constant 0 : index
    %202 = vector.load %arg22[%201, %c0_80] : memref<32x16xf32, #tpu.memory_space<vmem>>, vector<4x16xf32>
    tpu.vector_store %arg22[%201, %c0_80], %200 {strides = array<i32>} : memref<32x16xf32, #tpu.memory_space<vmem>>, vector<4x16xf32>,
    %c4_i32_81 = arith.constant 4 : i32
    %c4_i32_82 = arith.constant 4 : i32
    %203 = arith.muli %c4_i32_81, %c4_i32_82 : i32
    %204 = tpu.assume_multiple %203, 4 : i32
    %205 = arith.index_cast %204 : i32 to index
    %c0_83 = arith.constant 0 : index
    %206 = vector.load %arg21[%205, %c0_83] : memref<32x64xf32, #tpu.memory_space<vmem>>, vector<4x64xf32>
    %cst_84 = arith.constant dense<0.000000e+00> : vector<4x64xf32>
    %207 = tpu.matmul %200, %62, %cst_84 {dimension_numbers = #tpu.dot_dimension_numbers<[1], [0], [0], [1], [0, 0, 1, 1], [], []>} : vector<4x16xf32>, vector<16x64xf32>, vector<4x64xf32> -> vector<4x64xf32>
    %208 = arith.addf %206, %207 : vector<4x64xf32>
    %209 = vector.extract_strided_slice %208 {offsets = [0, 0], sizes = [4, 16], strides = [1, 1]} : vector<4x64xf32> to vector<4x16xf32>
    %210 = arith.negf %209 : vector<4x16xf32>
    %211 = math.exp %210 : vector<4x16xf32>
    %cst_85 = arith.constant 1.000000e+00 : f32
    %212 = vector.broadcast %cst_85 : f32 to vector<4x16xf32>
    %213 = arith.addf %212, %211 : vector<4x16xf32>
    %214 = arith.divf %212, %213 : vector<4x16xf32>
    %215 = vector.extract_strided_slice %208 {offsets = [0, 16], sizes = [4, 16], strides = [1, 1]} : vector<4x64xf32> to vector<4x16xf32>
    %216 = arith.negf %215 : vector<4x16xf32>
    %217 = math.exp %216 : vector<4x16xf32>
    %cst_86 = arith.constant 1.000000e+00 : f32
    %218 = vector.broadcast %cst_86 : f32 to vector<4x16xf32>
    %219 = arith.addf %218, %217 : vector<4x16xf32>
    %220 = arith.divf %218, %219 : vector<4x16xf32>
    %221 = vector.extract_strided_slice %208 {offsets = [0, 32], sizes = [4, 16], strides = [1, 1]} : vector<4x64xf32> to vector<4x16xf32>
    %222 = math.tanh %221 : vector<4x16xf32>
    %223 = vector.extract_strided_slice %208 {offsets = [0, 48], sizes = [4, 16], strides = [1, 1]} : vector<4x64xf32> to vector<4x16xf32>
    %224 = arith.negf %223 : vector<4x16xf32>
    %225 = math.exp %224 : vector<4x16xf32>
    %cst_87 = arith.constant 1.000000e+00 : f32
    %226 = vector.broadcast %cst_87 : f32 to vector<4x16xf32>
    %227 = arith.addf %226, %225 : vector<4x16xf32>
    %228 = arith.divf %226, %227 : vector<4x16xf32>
    %229 = arith.mulf %220, %198 : vector<4x16xf32>
    %230 = arith.mulf %214, %222 : vector<4x16xf32>
    %231 = arith.addf %229, %230 : vector<4x16xf32>
    %232 = math.tanh %231 : vector<4x16xf32>
    %233 = arith.mulf %228, %232 : vector<4x16xf32>
    %234 = arith.index_cast %204 : i32 to index
    %c0_88 = arith.constant 0 : index
    %235 = vector.load %arg22[%234, %c0_88] : memref<32x16xf32, #tpu.memory_space<vmem>>, vector<4x16xf32>
    tpu.vector_store %arg22[%234, %c0_88], %233 {strides = array<i32>} : memref<32x16xf32, #tpu.memory_space<vmem>>, vector<4x16xf32>,
    %c5_i32 = arith.constant 5 : i32
    %c4_i32_89 = arith.constant 4 : i32
    %236 = arith.muli %c5_i32, %c4_i32_89 : i32
    %237 = tpu.assume_multiple %236, 4 : i32
    %238 = arith.index_cast %237 : i32 to index
    %c0_90 = arith.constant 0 : index
    %239 = vector.load %arg21[%238, %c0_90] : memref<32x64xf32, #tpu.memory_space<vmem>>, vector<4x64xf32>
    %cst_91 = arith.constant dense<0.000000e+00> : vector<4x64xf32>
    %240 = tpu.matmul %233, %62, %cst_91 {dimension_numbers = #tpu.dot_dimension_numbers<[1], [0], [0], [1], [0, 0, 1, 1], [], []>} : vector<4x16xf32>, vector<16x64xf32>, vector<4x64xf32> -> vector<4x64xf32>
    %241 = arith.addf %239, %240 : vector<4x64xf32>
    %242 = vector.extract_strided_slice %241 {offsets = [0, 0], sizes = [4, 16], strides = [1, 1]} : vector<4x64xf32> to vector<4x16xf32>
    %243 = arith.negf %242 : vector<4x16xf32>
    %244 = math.exp %243 : vector<4x16xf32>
    %cst_92 = arith.constant 1.000000e+00 : f32
    %245 = vector.broadcast %cst_92 : f32 to vector<4x16xf32>
    %246 = arith.addf %245, %244 : vector<4x16xf32>
    %247 = arith.divf %245, %246 : vector<4x16xf32>
    %248 = vector.extract_strided_slice %241 {offsets = [0, 16], sizes = [4, 16], strides = [1, 1]} : vector<4x64xf32> to vector<4x16xf32>
    %249 = arith.negf %248 : vector<4x16xf32>
    %250 = math.exp %249 : vector<4x16xf32>
    %cst_93 = arith.constant 1.000000e+00 : f32
    %251 = vector.broadcast %cst_93 : f32 to vector<4x16xf32>
    %252 = arith.addf %251, %250 : vector<4x16xf32>
    %253 = arith.divf %251, %252 : vector<4x16xf32>
    %254 = vector.extract_strided_slice %241 {offsets = [0, 32], sizes = [4, 16], strides = [1, 1]} : vector<4x64xf32> to vector<4x16xf32>
    %255 = math.tanh %254 : vector<4x16xf32>
    %256 = vector.extract_strided_slice %241 {offsets = [0, 48], sizes = [4, 16], strides = [1, 1]} : vector<4x64xf32> to vector<4x16xf32>
    %257 = arith.negf %256 : vector<4x16xf32>
    %258 = math.exp %257 : vector<4x16xf32>
    %cst_94 = arith.constant 1.000000e+00 : f32
    %259 = vector.broadcast %cst_94 : f32 to vector<4x16xf32>
    %260 = arith.addf %259, %258 : vector<4x16xf32>
    %261 = arith.divf %259, %260 : vector<4x16xf32>
    %262 = arith.mulf %253, %231 : vector<4x16xf32>
    %263 = arith.mulf %247, %255 : vector<4x16xf32>
    %264 = arith.addf %262, %263 : vector<4x16xf32>
    %265 = math.tanh %264 : vector<4x16xf32>
    %266 = arith.mulf %261, %265 : vector<4x16xf32>
    %267 = arith.index_cast %237 : i32 to index
    %c0_95 = arith.constant 0 : index
    %268 = vector.load %arg22[%267, %c0_95] : memref<32x16xf32, #tpu.memory_space<vmem>>, vector<4x16xf32>
    tpu.vector_store %arg22[%267, %c0_95], %266 {strides = array<i32>} : memref<32x16xf32, #tpu.memory_space<vmem>>, vector<4x16xf32>,
    %c6_i32 = arith.constant 6 : i32
    %c4_i32_96 = arith.constant 4 : i32
    %269 = arith.muli %c6_i32, %c4_i32_96 : i32
    %270 = tpu.assume_multiple %269, 4 : i32
    %271 = arith.index_cast %270 : i32 to index
    %c0_97 = arith.constant 0 : index
    %272 = vector.load %arg21[%271, %c0_97] : memref<32x64xf32, #tpu.memory_space<vmem>>, vector<4x64xf32>
    %cst_98 = arith.constant dense<0.000000e+00> : vector<4x64xf32>
    %273 = tpu.matmul %266, %62, %cst_98 {dimension_numbers = #tpu.dot_dimension_numbers<[1], [0], [0], [1], [0, 0, 1, 1], [], []>} : vector<4x16xf32>, vector<16x64xf32>, vector<4x64xf32> -> vector<4x64xf32>
    %274 = arith.addf %272, %273 : vector<4x64xf32>
    %275 = vector.extract_strided_slice %274 {offsets = [0, 0], sizes = [4, 16], strides = [1, 1]} : vector<4x64xf32> to vector<4x16xf32>
    %276 = arith.negf %275 : vector<4x16xf32>
    %277 = math.exp %276 : vector<4x16xf32>
    %cst_99 = arith.constant 1.000000e+00 : f32
    %278 = vector.broadcast %cst_99 : f32 to vector<4x16xf32>
    %279 = arith.addf %278, %277 : vector<4x16xf32>
    %280 = arith.divf %278, %279 : vector<4x16xf32>
    %281 = vector.extract_strided_slice %274 {offsets = [0, 16], sizes = [4, 16], strides = [1, 1]} : vector<4x64xf32> to vector<4x16xf32>
    %282 = arith.negf %281 : vector<4x16xf32>
    %283 = math.exp %282 : vector<4x16xf32>
    %cst_100 = arith.constant 1.000000e+00 : f32
    %284 = vector.broadcast %cst_100 : f32 to vector<4x16xf32>
    %285 = arith.addf %284, %283 : vector<4x16xf32>
    %286 = arith.divf %284, %285 : vector<4x16xf32>
    %287 = vector.extract_strided_slice %274 {offsets = [0, 32], sizes = [4, 16], strides = [1, 1]} : vector<4x64xf32> to vector<4x16xf32>
    %288 = math.tanh %287 : vector<4x16xf32>
    %289 = vector.extract_strided_slice %274 {offsets = [0, 48], sizes = [4, 16], strides = [1, 1]} : vector<4x64xf32> to vector<4x16xf32>
    %290 = arith.negf %289 : vector<4x16xf32>
    %291 = math.exp %290 : vector<4x16xf32>
    %cst_101 = arith.constant 1.000000e+00 : f32
    %292 = vector.broadcast %cst_101 : f32 to vector<4x16xf32>
    %293 = arith.addf %292, %291 : vector<4x16xf32>
    %294 = arith.divf %292, %293 : vector<4x16xf32>
    %295 = arith.mulf %286, %264 : vector<4x16xf32>
    %296 = arith.mulf %280, %288 : vector<4x16xf32>
    %297 = arith.addf %295, %296 : vector<4x16xf32>
    %298 = math.tanh %297 : vector<4x16xf32>
    %299 = arith.mulf %294, %298 : vector<4x16xf32>
    %300 = arith.index_cast %270 : i32 to index
    %c0_102 = arith.constant 0 : index
    %301 = vector.load %arg22[%300, %c0_102] : memref<32x16xf32, #tpu.memory_space<vmem>>, vector<4x16xf32>
    tpu.vector_store %arg22[%300, %c0_102], %299 {strides = array<i32>} : memref<32x16xf32, #tpu.memory_space<vmem>>, vector<4x16xf32>,
    %c7_i32 = arith.constant 7 : i32
    %c4_i32_103 = arith.constant 4 : i32
    %302 = arith.muli %c7_i32, %c4_i32_103 : i32
    %303 = tpu.assume_multiple %302, 4 : i32
    %304 = arith.index_cast %303 : i32 to index
    %c0_104 = arith.constant 0 : index
    %305 = vector.load %arg21[%304, %c0_104] : memref<32x64xf32, #tpu.memory_space<vmem>>, vector<4x64xf32>
    %cst_105 = arith.constant dense<0.000000e+00> : vector<4x64xf32>
    %306 = tpu.matmul %299, %62, %cst_105 {dimension_numbers = #tpu.dot_dimension_numbers<[1], [0], [0], [1], [0, 0, 1, 1], [], []>} : vector<4x16xf32>, vector<16x64xf32>, vector<4x64xf32> -> vector<4x64xf32>
    %307 = arith.addf %305, %306 : vector<4x64xf32>
    %308 = vector.extract_strided_slice %307 {offsets = [0, 0], sizes = [4, 16], strides = [1, 1]} : vector<4x64xf32> to vector<4x16xf32>
    %309 = arith.negf %308 : vector<4x16xf32>
    %310 = math.exp %309 : vector<4x16xf32>
    %cst_106 = arith.constant 1.000000e+00 : f32
    %311 = vector.broadcast %cst_106 : f32 to vector<4x16xf32>
    %312 = arith.addf %311, %310 : vector<4x16xf32>
    %313 = arith.divf %311, %312 : vector<4x16xf32>
    %314 = vector.extract_strided_slice %307 {offsets = [0, 16], sizes = [4, 16], strides = [1, 1]} : vector<4x64xf32> to vector<4x16xf32>
    %315 = arith.negf %314 : vector<4x16xf32>
    %316 = math.exp %315 : vector<4x16xf32>
    %cst_107 = arith.constant 1.000000e+00 : f32
    %317 = vector.broadcast %cst_107 : f32 to vector<4x16xf32>
    %318 = arith.addf %317, %316 : vector<4x16xf32>
    %319 = arith.divf %317, %318 : vector<4x16xf32>
    %320 = vector.extract_strided_slice %307 {offsets = [0, 32], sizes = [4, 16], strides = [1, 1]} : vector<4x64xf32> to vector<4x16xf32>
    %321 = math.tanh %320 : vector<4x16xf32>
    %322 = vector.extract_strided_slice %307 {offsets = [0, 48], sizes = [4, 16], strides = [1, 1]} : vector<4x64xf32> to vector<4x16xf32>
    %323 = arith.negf %322 : vector<4x16xf32>
    %324 = math.exp %323 : vector<4x16xf32>
    %cst_108 = arith.constant 1.000000e+00 : f32
    %325 = vector.broadcast %cst_108 : f32 to vector<4x16xf32>
    %326 = arith.addf %325, %324 : vector<4x16xf32>
    %327 = arith.divf %325, %326 : vector<4x16xf32>
    %328 = arith.mulf %319, %297 : vector<4x16xf32>
    %329 = arith.mulf %313, %321 : vector<4x16xf32>
    %330 = arith.addf %328, %329 : vector<4x16xf32>
    %331 = math.tanh %330 : vector<4x16xf32>
    %332 = arith.mulf %327, %331 : vector<4x16xf32>
    %333 = arith.index_cast %303 : i32 to index
    %c0_109 = arith.constant 0 : index
    %334 = vector.load %arg22[%333, %c0_109] : memref<32x16xf32, #tpu.memory_space<vmem>>, vector<4x16xf32>
    tpu.vector_store %arg22[%333, %c0_109], %332 {strides = array<i32>} : memref<32x16xf32, #tpu.memory_space<vmem>>, vector<4x16xf32>,
    %c8_i32 = arith.constant 8 : i32
    %c0_110 = arith.constant 0 : index
    %c0_111 = arith.constant 0 : index
    %335 = vector.load %arg22[%c0_110, %c0_111] : memref<32x16xf32, #tpu.memory_space<vmem>>, vector<32x16xf32>
    %c0_112 = arith.constant 0 : index
    %c0_113 = arith.constant 0 : index
    %336 = vector.load %arg16[%c0_112, %c0_113] : memref<16x8xf32, #tpu.memory_space<vmem>>, vector<16x8xf32>
    %cst_114 = arith.constant dense<0.000000e+00> : vector<32x8xf32>
    %337 = tpu.matmul %335, %336, %cst_114 {dimension_numbers = #tpu.dot_dimension_numbers<[1], [0], [0], [1], [0, 0, 1, 1], [], []>} : vector<32x16xf32>, vector<16x8xf32>, vector<32x8xf32> -> vector<32x8xf32>
    %c0_115 = arith.constant 0 : index
    %c0_116 = arith.constant 0 : index
    %338 = vector.load %arg17[%c0_115, %c0_116] : memref<1x8xf32, #tpu.memory_space<vmem>>, vector<1x8xf32>
    %339 = vector.broadcast %338 : vector<1x8xf32> to vector<32x8xf32>
    %340 = arith.addf %337, %339 : vector<32x8xf32>
    %cst_117 = arith.constant dense<0.000000e+00> : vector<32xf32>
    %341 = vector.multi_reduction <add>, %340, %cst_117 [1] : vector<32x8xf32> to vector<32xf32>
    %342 = vector.shape_cast %341 : vector<32xf32> to vector<32x1xf32>
    %343 = arith.mulf %340, %340 : vector<32x8xf32>
    %cst_118 = arith.constant dense<0.000000e+00> : vector<32xf32>
    %344 = vector.multi_reduction <add>, %343, %cst_118 [1] : vector<32x8xf32> to vector<32xf32>
    %345 = vector.shape_cast %344 : vector<32xf32> to vector<32x1xf32>
    %cst_119 = arith.constant dense<0.000000e+00> : vector<4x1xf32>
    %346 = tpu.matmul %2, %342, %cst_119 {dimension_numbers = #tpu.dot_dimension_numbers<[1], [0], [0], [1], [0, 0, 1, 1], [], []>} : vector<4x32xf32>, vector<32x1xf32>, vector<4x1xf32> -> vector<4x1xf32>
    %cst_120 = arith.constant dense<0.000000e+00> : vector<4x1xf32>
    %347 = tpu.matmul %2, %345, %cst_120 {dimension_numbers = #tpu.dot_dimension_numbers<[1], [0], [0], [1], [0, 0, 1, 1], [], []>} : vector<4x32xf32>, vector<32x1xf32>, vector<4x1xf32> -> vector<4x1xf32>
    %348 = arith.mulf %346, %346 : vector<4x1xf32>
    %349 = arith.subf %347, %348 : vector<4x1xf32>
    %cst_121 = arith.constant 0.000000e+00 : f32
    %350 = vector.broadcast %cst_121 : f32 to vector<4x1xf32>
    %351 = arith.maximumf %349, %350 : vector<4x1xf32>
    %cst_122 = arith.constant 9.99999974E-6 : f32
    %352 = vector.broadcast %cst_122 : f32 to vector<4x1xf32>
    %353 = arith.addf %351, %352 : vector<4x1xf32>
    %354 = math.rsqrt %353 : vector<4x1xf32>
    %cst_123 = arith.constant dense<0.000000e+00> : vector<32x1xf32>
    %355 = tpu.matmul %3, %346, %cst_123 {dimension_numbers = #tpu.dot_dimension_numbers<[1], [0], [0], [1], [0, 0, 1, 1], [], []>} : vector<32x4xf32>, vector<4x1xf32>, vector<32x1xf32> -> vector<32x1xf32>
    %cst_124 = arith.constant dense<0.000000e+00> : vector<32x1xf32>
    %356 = tpu.matmul %3, %354, %cst_124 {dimension_numbers = #tpu.dot_dimension_numbers<[1], [0], [0], [1], [0, 0, 1, 1], [], []>} : vector<32x4xf32>, vector<4x1xf32>, vector<32x1xf32> -> vector<32x1xf32>
    %357 = vector.broadcast %355 : vector<32x1xf32> to vector<32x8xf32>
    %358 = arith.subf %340, %357 : vector<32x8xf32>
    %359 = vector.broadcast %356 : vector<32x1xf32> to vector<32x8xf32>
    %360 = arith.mulf %358, %359 : vector<32x8xf32>
    %c0_125 = arith.constant 0 : index
    %c0_126 = arith.constant 0 : index
    %361 = vector.load %arg18[%c0_125, %c0_126] : memref<1x8xf32, #tpu.memory_space<vmem>>, vector<1x8xf32>
    %362 = vector.broadcast %361 : vector<1x8xf32> to vector<32x8xf32>
    %363 = arith.mulf %360, %362 : vector<32x8xf32>
    %c0_127 = arith.constant 0 : index
    %c0_128 = arith.constant 0 : index
    %364 = vector.load %arg19[%c0_127, %c0_128] : memref<1x8xf32, #tpu.memory_space<vmem>>, vector<1x8xf32>
    %365 = vector.broadcast %364 : vector<1x8xf32> to vector<32x8xf32>
    %366 = arith.addf %363, %365 : vector<32x8xf32>
    %367 = arith.addf %61, %366 : vector<32x8xf32>
    %c0_129 = arith.constant 0 : index
    %c0_130 = arith.constant 0 : index
    %c0_131 = arith.constant 0 : index
    %368 = vector.load %arg20[%c0_129, %c0_130, %c0_131] : memref<1x32x8xf32, #tpu.memory_space<vmem>>, vector<1x32x8xf32>
    %369 = vector.shape_cast %368 : vector<1x32x8xf32> to vector<32x8xf32>
    %370 = vector.shape_cast %367 : vector<32x8xf32> to vector<1x32x8xf32>
    tpu.vector_store %arg20[%c0_129, %c0_130, %c0_131], %370 {strides = array<i32>} : memref<1x32x8xf32, #tpu.memory_space<vmem>>, vector<1x32x8xf32>,
    return
  }
  func.func @transform_0(%arg0: i32) -> (i32, i32, i32) {
    %c0_i32 = arith.constant 0 : i32
    %c0_i32_0 = arith.constant 0 : i32
    %c0_i32_1 = arith.constant 0 : i32
    return %arg0, %c0_i32, %c0_i32_0 : i32, i32, i32
  }
  func.func @transform_1(%arg0: i32) -> (i32, i32) {
    %c0_i32 = arith.constant 0 : i32
    %c0_i32_0 = arith.constant 0 : i32
    %c0_i32_1 = arith.constant 0 : i32
    return %c0_i32, %c0_i32_0 : i32, i32
  }
  func.func @transform_2(%arg0: i32) -> (i32, i32) {
    %c0_i32 = arith.constant 0 : i32
    %c0_i32_0 = arith.constant 0 : i32
    %c0_i32_1 = arith.constant 0 : i32
    return %c0_i32, %c0_i32_0 : i32, i32
  }
  func.func @transform_3(%arg0: i32) -> (i32, i32) {
    %c0_i32 = arith.constant 0 : i32
    %c0_i32_0 = arith.constant 0 : i32
    %c0_i32_1 = arith.constant 0 : i32
    return %c0_i32, %c0_i32_0 : i32, i32
  }
  func.func @transform_4(%arg0: i32) -> (i32, i32) {
    %c0_i32 = arith.constant 0 : i32
    %c0_i32_0 = arith.constant 0 : i32
    %c0_i32_1 = arith.constant 0 : i32
    return %c0_i32, %c0_i32_0 : i32, i32
  }
  func.func @transform_5(%arg0: i32) -> (i32, i32) {
    %c0_i32 = arith.constant 0 : i32
    %c0_i32_0 = arith.constant 0 : i32
    %c0_i32_1 = arith.constant 0 : i32
    return %c0_i32, %c0_i32_0 : i32, i32
  }
  func.func @transform_6(%arg0: i32) -> (i32, i32) {
    %c0_i32 = arith.constant 0 : i32
    %c0_i32_0 = arith.constant 0 : i32
    %c0_i32_1 = arith.constant 0 : i32
    return %c0_i32, %c0_i32_0 : i32, i32
  }
  func.func @transform_7(%arg0: i32) -> (i32, i32) {
    %c0_i32 = arith.constant 0 : i32
    %c0_i32_0 = arith.constant 0 : i32
    %c0_i32_1 = arith.constant 0 : i32
    return %c0_i32, %c0_i32_0 : i32, i32
  }
  func.func @transform_8(%arg0: i32) -> (i32, i32) {
    %c0_i32 = arith.constant 0 : i32
    %c0_i32_0 = arith.constant 0 : i32
    %c0_i32_1 = arith.constant 0 : i32
    return %c0_i32, %c0_i32_0 : i32, i32
  }
  func.func @transform_9(%arg0: i32) -> (i32, i32) {
    %c0_i32 = arith.constant 0 : i32
    %c0_i32_0 = arith.constant 0 : i32
    %c0_i32_1 = arith.constant 0 : i32
    return %c0_i32, %c0_i32_0 : i32, i32
  }
  func.func @transform_10(%arg0: i32) -> (i32, i32) {
    %c0_i32 = arith.constant 0 : i32
    %c0_i32_0 = arith.constant 0 : i32
    %c0_i32_1 = arith.constant 0 : i32
    return %c0_i32, %c0_i32_0 : i32, i32
  }
  func.func @transform_11(%arg0: i32) -> (i32, i32) {
    %c0_i32 = arith.constant 0 : i32
    %c0_i32_0 = arith.constant 0 : i32
    %c0_i32_1 = arith.constant 0 : i32
    return %c0_i32, %c0_i32_0 : i32, i32
  }
  func.func @transform_12(%arg0: i32) -> (i32, i32) {
    %c0_i32 = arith.constant 0 : i32
    %c0_i32_0 = arith.constant 0 : i32
    %c0_i32_1 = arith.constant 0 : i32
    return %c0_i32, %c0_i32_0 : i32, i32
  }
  func.func @transform_13(%arg0: i32) -> (i32, i32) {
    %c0_i32 = arith.constant 0 : i32
    %c0_i32_0 = arith.constant 0 : i32
    %c0_i32_1 = arith.constant 0 : i32
    return %c0_i32, %c0_i32_0 : i32, i32
  }
  func.func @transform_14(%arg0: i32) -> (i32, i32) {
    %c0_i32 = arith.constant 0 : i32
    %c0_i32_0 = arith.constant 0 : i32
    %c0_i32_1 = arith.constant 0 : i32
    return %c0_i32, %c0_i32_0 : i32, i32
  }
  func.func @transform_15(%arg0: i32) -> (i32, i32) {
    %c0_i32 = arith.constant 0 : i32
    %c0_i32_0 = arith.constant 0 : i32
    %c0_i32_1 = arith.constant 0 : i32
    return %c0_i32, %c0_i32_0 : i32, i32
  }
  func.func @transform_16(%arg0: i32) -> (i32, i32) {
    %c0_i32 = arith.constant 0 : i32
    %c0_i32_0 = arith.constant 0 : i32
    %c0_i32_1 = arith.constant 0 : i32
    return %c0_i32, %c0_i32_0 : i32, i32
  }
  func.func @transform_17(%arg0: i32) -> (i32, i32) {
    %c0_i32 = arith.constant 0 : i32
    %c0_i32_0 = arith.constant 0 : i32
    %c0_i32_1 = arith.constant 0 : i32
    return %c0_i32, %c0_i32_0 : i32, i32
  }
  func.func @transform_18(%arg0: i32) -> (i32, i32) {
    %c0_i32 = arith.constant 0 : i32
    %c0_i32_0 = arith.constant 0 : i32
    %c0_i32_1 = arith.constant 0 : i32
    return %c0_i32, %c0_i32_0 : i32, i32
  }
  func.func @transform_19(%arg0: i32) -> (i32, i32, i32) {
    %c0_i32 = arith.constant 0 : i32
    %c0_i32_0 = arith.constant 0 : i32
    %c0_i32_1 = arith.constant 0 : i32
    return %arg0, %c0_i32, %c0_i32_0 : i32, i32, i32
  }
}

</mosaic_0001>

<bundles_post_ra>
// kernel: tpu_custom_call.1
= control target key start
LH: loop header
LB: loop body
LE: loop exit
PB: predicated region body
PF: predicated region fallthrough
CT: control target
= control target key end

     0   :  { %vm71_vm0 = vcmask 64512   ;;  %v3200_v16 = vmov 0.0|0.0   ;;  %vm3201_vm1 = vmmov 0   ;;  %v3202_v17 = vmov 0.0   ;;  %s3207_s21 = smov 80   ;;  %s3729_s0 = inlined_call_operand.vmem [shape: f32[1,32,8], index: 0, kind: input, shape index: {}]   ;;  %s3730_s1 = inlined_call_operand.vmem [shape: f32[4,32], index: 1, kind: input, shape index: {}]   ;;  %s3731_s2 = inlined_call_operand.vmem [shape: f32[32,4], index: 2, kind: input, shape index: {}]   ;;  %s3732_s5 = inlined_call_operand.vmem [shape: f32[8,48], index: 5, kind: input, shape index: {}]   ;;  %s3733_s3 = inlined_call_operand.vmem [shape: f32[16,32], index: 3, kind: input, shape index: {}]   ;;  %s3734_s7 = inlined_call_operand.vmem [shape: f32[48,48], index: 7, kind: input, shape index: {}]   ;;  %s3735_s6 = inlined_call_operand.vmem [shape: f32[1,48], index: 6, kind: input, shape index: {}]   ;;  %s3736_s10 = inlined_call_operand.vmem [shape: f32[48,8], index: 10, kind: input, shape index: {}]   ;;  %s3737_s8 = inlined_call_operand.vmem [shape: f32[1,48], index: 8, kind: input, shape index: {}]   ;;  %s3738_s4 = inlined_call_operand.vmem [shape: f32[32,16], index: 4, kind: input, shape index: {}]   ;;  %s3739_s11 = inlined_call_operand.vmem [shape: f32[1,8], index: 11, kind: input, shape index: {}]   ;;  %s3740_s9 = inlined_call_operand.vmem [shape: f32[48,8], index: 9, kind: input, shape index: {}]   ;;  %s3741_s12 = inlined_call_operand.vmem [shape: f32[8,64], index: 12, kind: input, shape index: {}]   ;;  %s3742_s13 = inlined_call_operand.vmem [shape: f32[16,64], index: 13, kind: input, shape index: {}]   ;;  %s3743_s14 = inlined_call_operand.vmem [shape: f32[1,64], index: 14, kind: input, shape index: {}]   ;;  %s3744_s15 = inlined_call_operand.vmem [shape: f32[16,8], index: 15, kind: input, shape index: {}]   ;;  %s3745_s16 = inlined_call_operand.vmem [shape: f32[1,8], index: 16, kind: input, shape index: {}]   ;;  %s3746_s17 = inlined_call_operand.vmem [shape: f32[1,8], index: 17, kind: input, shape index: {}]   ;;  %s3747_s18 = inlined_call_operand.vmem [shape: f32[1,8], index: 18, kind: input, shape index: {}]   ;;  %s3748_s19 = inlined_call_operand.vmem [shape: f32[1,32,8], index: 19, kind: output, shape index: {}]  }
   0x1   :  { %3752 = sst [smem:[#allocation4_spill]] %s3729_s0  ;;  %3013 = vmatprep.subr.bf16.mxu0 %v3200_v16  ;;  %3019 = vmatprep.subr.bf16.mxu1 %v3200_v16  ;;  %vm100_vm2 = vcmask 261120   ;;  %vm249_vm3 = vcmask 31744   ;;  %v3203_v32 = vmov 0   ;;  %vm262_vm4 = vcmask 1043456  }
   0x2   :  { %3753 = sst [smem:[#allocation5_spill]] %s3730_s1  ;;  %s3756_s20 = sld [smem:[#allocation4_spill]]  ;;  %2794 = vmatprep.mubr.msk.f32.mxu0 %vm3201_vm1, %v3202_v17  ;;  %2805 = vmatprep.mubr.msk.f32.mxu1 %vm3201_vm1, %v3202_v17  ;;  %vm700_vm9 = vcmask 392192   ;;  %vm886_vm12 = vcmask 130048  }
   0x3   :  { %3754 = sst [smem:[#allocation6_spill]] %s3731_s2  ;;  %s3757_s26 = sld [smem:[#allocation5_spill]]  ;;  %3126 = vset.pattern.permute.xlu1 %v3203_v32  ;;  %3125 = vset.pattern.permute.xlu0 %v3203_v32 }
   0x4   :  { %3755 = sst [smem:[#allocation7_spill]] %s3732_s5  ;;  %s3758_s29 = sld [smem:[#allocation6_spill]] }
   0x5   :  { %s3759_s24 = sld [smem:[#allocation7_spill]] }
   0x8   :  { %v3311_v0 = vld [vmem:[%s3756_s20] sm:$0xff]  ;;  %v3316_v1 = vld [vmem:[%s3756_s20 + $0x8] sm:$0xff]  ;;  %v3330_v7 = vld [vmem:[%s3756_s20 + $0x10] sm:$0xff] }
   0x9   :  { %v72_v2 = vsel %vm71_vm0, %v3311_v0, 0.0  ;;  %v84_v3 = vmul.f32 %v3311_v0, %v3311_v0  ;;  %v85_v4 = vmul.f32 %v3316_v1, %v3316_v1  ;;  %v75_v6 = vsel %vm71_vm0, %v3316_v1, 0.0  ;;  %v3336_v9 = vld [vmem:[%s3756_s20 + $0x18] sm:$0xff]  ;;  %v66_v28 = vld [vmem:[%s3757_s26] sm:$0xf]  ;;  %s3205_s20 = smov 16  }
   0xa   :  { %73 = vadd.xlane.f32.xlu0 %v72_v2  ;;  %v78_v10 = vsel %vm71_vm0, %v3330_v7, 0.0  ;;  %v86_v11 = vmul.f32 %v3330_v7, %v3330_v7  ;;  %v81_v12 = vsel %vm71_vm0, %v3336_v9, 0.0  ;;  %v87_v13 = vmul.f32 %v3336_v9, %v3336_v9  ;;  %v67_v31 = vld [vmem:[%s3758_s29] sm:$0xff]  ;;  %v68_v34 = vld [vmem:[%s3758_s29 + $0x8] sm:$0xff]  ;;  %v69_v37 = vld [vmem:[%s3758_s29 + $0x10] sm:$0xff] }
   0xb   :  { %v88_v5 = vsel %vm71_vm0, %v84_v3, 0.0  ;;  %v91_v8 = vsel %vm71_vm0, %v85_v4, 0.0  ;;  %v70_v39 = vld [vmem:[%s3758_s29 + $0x18] sm:$0xff]  ;;  %v487_v53 = vld [vmem:[%s3759_s24] sm:$0xff] }
   0xc   :  { %89 = vadd.xlane.f32.xlu1 %v88_v5  ;;  %v94_v14 = vsel %vm71_vm0, %v86_v11, 0.0  ;;  %v97_v15 = vsel %vm71_vm0, %v87_v13, 0.0  ;;  %v687_v11 = vld [vmem:[%s3734_s7] sm:$0xff]  ;;  %v689_v13 = vld [vmem:[%s3734_s7 + $0x10] sm:$0xff] }
   0xe   :  { %76 = vadd.xlane.f32.xlu0 %v75_v6 }
  0x10   :  { %92 = vadd.xlane.f32.xlu1 %v91_v8 }
  0x12   :  { %79 = vadd.xlane.f32.xlu0 %v78_v10  ;;  %v604_v10 = vld [vmem:[%s3733_s3] sm:$0xff] }
  0x14   :  { %82 = vadd.xlane.f32.xlu1 %v81_v12  ;;  %v688_v12 = vld [vmem:[%s3734_s7 + $0x8] sm:$0xff] }
  0x16   :  { %95 = vadd.xlane.f32.xlu0 %v94_v14  ;;  %v3033_v14 = vpack.c.bf16 %v688_v12, %v687_v11  ;;  %v986_v12 = vld [vmem:[%s3740_s9 + $0x10] sm:$0xff] }
  0x18   :  { %98 = vadd.xlane.f32.xlu1 %v97_v15  ;;  %v690_v15 = vld [vmem:[%s3734_s7 + $0x18] sm:$0xff] }
  0x97   :  { %v74_v18 = vpop.xlane.xlu0 %73 }
  0x99   :  { %v90_v19 = vpop.xlane.xlu1 %89 }
  0x9b   :  { %v77_v20 = vpop.xlane.xlu0 %76 }
  0x9c   :  { %v3014_v21 = vpack.c.bf16 %v77_v20, %v74_v18  ;;  %v3037_v18 = vpack.c.bf16 %v690_v15, %v689_v13  ;;  %v692_v20 = vld [vmem:[%s3734_s7 + $0x28] sm:$0xff]  ;;  %v987_v13 = vld [vmem:[%s3740_s9 + $0x18] sm:$0xff]  ;;  %v884_v15 = vld [vmem:[%s3738_s4 + $0x10] sm:$0xff] }
  0x9d   :  { %v93_v22 = vpop.xlane.xlu1 %92 }
  0x9e   :  { %v3020_v23 = vpack.c.bf16 %v93_v22, %v90_v19  ;;  %3015 = vmatpush3.bf16.msra.mxu0 %v3014_v21  ;;  %v691_v19 = vld [vmem:[%s3734_s7 + $0x20] sm:$0xff] }
  0x9f   :  { %v80_v24 = vpop.xlane.xlu0 %79  ;;  %3016 = vmatprep.subr.bf16.mxu0 %v3200_v16  ;;  %v3041_v21 = vpack.c.bf16 %v692_v20, %v691_v19  ;;  %v2608_v22 = vld [vmem:[%s3735_s6] ss:$0 sm:$0xff]  ;;  %v989_v20 = vld [vmem:[%s3740_s9 + $0x28] sm:$0xff] }
  0xa0   :  { %3021 = vmatpush3.bf16.msra.mxu1 %v3020_v23  ;;  %v988_v19 = vld [vmem:[%s3740_s9 + $0x20] sm:$0xff] }
  0xa1   :  { %v83_v25 = vpop.xlane.xlu1 %82  ;;  %3022 = vmatprep.subr.bf16.mxu1 %v3200_v16 }
  0xa2   :  { %v3017_v26 = vpack.c.bf16 %v83_v25, %v80_v24 }
  0xa3   :  { %v96_v27 = vpop.xlane.xlu0 %95 }
  0xa4   :  { %3018 = vmatpush3.bf16.msra.mxu0 %v3017_v26 }
  0xa5   :  { %v99_v29 = vpop.xlane.xlu1 %98 }
  0xa6   :  { %v3023_v30 = vpack.c.bf16 %v99_v29, %v96_v27 }
  0xa7   :  { %2795 = vmatmul.mubr.msk.f32.vlgmr.msra.gmra.mrb[0].mxu0 %vm100_vm2, %v66_v28 }
  0xa8   :  { %3024 = vmatpush3.bf16.msra.mxu1 %v3023_v30  ;;  %2810 = vmatprep.mubr.msk.f32.mxu0 %vm249_vm3, %v67_v31 }
  0xab   :  { %2806 = vmatmul.mubr.msk.f32.vlgmr.msra.gmra.mrb[0].mxu1 %vm100_vm2, %v66_v28 }
  0xac   :  { %2818 = vmatprep.mubr.msk.f32.mxu1 %vm249_vm3, %v67_v31 }
 0x17a   :  { %v170_v33 = vpop.f32.mrb[0].mxu0 }
 0x17b   :  { %v2796_v35 = vpop.f32.mrb[1].mxu0  ;;  %2808 = vmatprep.subr.msk.mxu0 %vm262_vm4, %v170_v33  ;;  %v244_v36 = vmul.f32 %v170_v33, %v170_v33 }
 0x17c   :  { %2809 = vmatpush3.msk.msra.mxu0 %vm262_vm4, %v170_v33 }
 0x17d   :  { %2811 = vmatmul.mubr.msk.f32.vlgmr.msra.gmra.mrb[2].mxu0 %vm249_vm3, %v68_v34  ;;  %2824 = vmatprep.subr.mxu0 %v487_v53 }
 0x17e   :  { %v240_v38 = vpop.f32.mrb[0].mxu1  ;;  %2813 = vmatprep.mubr.msk.f32.mxu0 %vm249_vm3, %v69_v37  ;;  %2825 = vmatpush3.msra.mxu0 %v487_v53  ;;  %v2615_v53 = vld [vmem:[%s3737_s8] ss:$0 sm:$0xff] }
 0x17f   :  { %v245_v40 = vsub.f32 %v240_v38, %v244_v36  ;;  %v2807_v41 = vpop.f32.mrb[1].mxu1  ;;  %3034 = vmatprep.subr.bf16.mxu0 %v3033_v14 }
 0x180   :  { %v605_v41 = vld [vmem:[%s3733_s3 + $0x8] sm:$0xff]  ;;  %s3206_s3 = smov 32  }
 0x181   :  { %v246_v42 = vmax.f32 %v245_v40, 0.0  ;;  %2814 = vmatmul.mubr.msk.f32.gmra.mrb[4].mxu0 %vm249_vm3, %v70_v39 }
 0x183   :  { %v247_v43 = vadd.f32 1e-05, %v246_v42  ;;  %v788_v42 = vld [vmem:[%s3736_s10] sm:$0xff] }
 0x185   :  { %3127 = vrsqrt.f32 %v247_v43  ;;  %v789_v43 = vld [vmem:[%s3736_s10 + $0x8] sm:$0xff] }
 0x18f   :  { %v3128_v44 = vpop.eup %3127 }
 0x190   :  { %2816 = vmatprep.subr.msk.mxu1 %vm262_vm4, %v3128_v44 }
 0x191   :  { %2817 = vmatpush3.msk.msra.mxu1 %vm262_vm4, %v3128_v44  ;;  %v3045_v44 = vpack.c.bf16 %v789_v43, %v788_v42 }
 0x192   :  { %2819 = vmatmul.mubr.msk.f32.vlgmr.msra.gmra.mrb[2].mxu1 %vm249_vm3, %v68_v34 }
 0x193   :  { %2821 = vmatprep.mubr.msk.f32.mxu1 %vm249_vm3, %v69_v37 }
 0x196   :  { %2822 = vmatmul.mubr.msk.f32.gmra.mrb[4].mxu1 %vm249_vm3, %v70_v39 }
 0x197   :  { %2840 = vmatprep.mubr.msk.f32.mxu1 %vm100_vm2, %v604_v10 }
 0x250   :  { %v2812_v45 = vpop.f32.mrb[2].mxu0 }
 0x251   :  { %446 = vperm.xlu1 %3126, %v2812_v45   ;;  %v332_v46 = vpop.f32.mrb[3].mxu0 }
 0x252   :  { %441 = vperm.xlu0 %3125, %v332_v46  }
 0x254   :  { %v2815_v47 = vpop.f32.mrb[4].mxu0 }
 0x255   :  { %456 = vperm.xlu1 %3126, %v2815_v47   ;;  %v342_v48 = vpop.f32.mrb[5].mxu0  ;;  %v790_v47 = vld [vmem:[%s3736_s10 + $0x10] sm:$0xff] }
 0x259   :  { %451 = vperm.xlu1 %3126, %v342_v48   ;;  %v791_v48 = vld [vmem:[%s3736_s10 + $0x18] sm:$0xff] }
 0x265   :  { %v2820_v49 = vpop.f32.mrb[2].mxu1 }
 0x266   :  { %470 = vperm.xlu1 %3126, %v2820_v49   ;;  %v420_v50 = vpop.f32.mrb[3].mxu1  ;;  %v3049_v49 = vpack.c.bf16 %v791_v48, %v790_v47 }
 0x269   :  { %v2823_v51 = vpop.f32.mrb[4].mxu1 }
 0x26a   :  { %465 = vperm.xlu1 %3126, %v420_v50   ;;  %v430_v52 = vpop.f32.mrb[5].mxu1  ;;  %v792_v50 = vld [vmem:[%s3736_s10 + $0x20] sm:$0xff] }
 0x26e   :  { %475 = vperm.xlu1 %3126, %v430_v52  }
 0x272   :  { %480 = vperm.xlu1 %3126, %v2823_v51   ;;  %v793_v51 = vld [vmem:[%s3736_s10 + $0x28] sm:$0xff] }
 0x273   :  { %v3053_v52 = vpack.c.bf16 %v793_v51, %v792_v50 }
 0x2d0   :  { %v447_v54 = vpop.permute.xlu1 %446 }
 0x2d1   :  { %v442_v57 = vpop.permute.xlu0 %441  ;;  %v460_v60 = vsub.f32 %v3316_v1, %v447_v54 }
 0x2d2   :  { %v459_v59 = vsub.f32 %v3311_v0, %v442_v57 }
 0x2d4   :  { %v457_v55 = vpop.permute.xlu1 %456 }
 0x2d5   :  { %v462_v5 = vsub.f32 %v3336_v9, %v457_v55 }
 0x2d8   :  { %v452_v56 = vpop.permute.xlu1 %451 }
 0x2d9   :  { %v461_v2 = vsub.f32 %v3330_v7, %v452_v56 }
 0x2e5   :  { %v471_v58 = vpop.permute.xlu1 %470 }
 0x2e6   :  { %v484_v63 = vmul.f32 %v471_v58, %v460_v60 }
 0x2e9   :  { %v466_v61 = vpop.permute.xlu1 %465 }
 0x2ea   :  { %v483_v62 = vmul.f32 %v466_v61, %v459_v59 }
 0x2ec   :  { %2826 = vmatprep.mubr.msk.f32.mxu0 %vm71_vm0, %v483_v62  ;;  %v882_v62 = vld [vmem:[%s3738_s4] sm:$0xff] }
 0x2ed   :  { %v476_v3 = vpop.permute.xlu1 %475  ;;  %2827 = vmatmul.mubr.msk.f32.vlgmr.msra.gmra.mrb[6].mxu0 %vm71_vm0, %v484_v63  ;;  %v2618_v63 = vld [vmem:[%s3739_s11] ss:$0 sm:$0xff] }
 0x2ee   :  { %v485_v4 = vmul.f32 %v476_v3, %v461_v2  ;;  %3036 = vmatpush3.bf16.msra.mxu0 %v3033_v14  ;;  %v883_v14 = vld [vmem:[%s3738_s4 + $0x8] sm:$0xff] }
 0x2ef   :  { %3038 = vmatprep.subr.bf16.mxu0 %v3037_v18 }
 0x2f0   :  { %2829 = vmatprep.mubr.msk.f32.mxu0 %vm71_vm0, %v485_v4 }
 0x2f1   :  { %v481_v6 = vpop.permute.xlu1 %480 }
 0x2f2   :  { %v486_v8 = vmul.f32 %v481_v6, %v462_v5  ;;  %3040 = vmatpush3.bf16.msra.mxu0 %v3037_v18  ;;  %v984_v5 = vld [vmem:[%s3740_s9] sm:$0xff]  ;;  %v985_v6 = vld [vmem:[%s3740_s9 + $0x8] sm:$0xff]  ;;  %v3065_v18 = vpack.c.bf16 %v987_v13, %v986_v12 }
 0x2f3   :  { %3042 = vmatprep.subr.bf16.mxu0 %v3041_v21  ;;  %v3061_v11 = vpack.c.bf16 %v985_v6, %v984_v5 }
 0x2f4   :  { %2830 = vmatmul.mubr.msk.f32.gmra.mrb[8].mxu0 %vm71_vm0, %v486_v8 }
 0x2f6   :  { %3044 = vmatpush3.bf16.msra.mxu0 %v3041_v21  ;;  %v885_v21 = vld [vmem:[%s3738_s4 + $0x18] sm:$0xff] }
 0x3c0   :  { %v2828_v23 = vpop.f32.mrb[6].mxu0 }
 0x3c1   :  { %v579_v24 = vadd.f32 %v2828_v23, %v2608_v22  ;;  %v573_v25 = vpop.f32.mrb[7].mxu0  ;;  %v1105_v23 = vld [vmem:[%s3741_s12] sm:$0xff] }
 0x3c2   :  { %v574_v26 = vadd.f32 %v2608_v22, %v573_v25  ;;  %v1104_v25 = vld [vmem:[%s3742_s13 + $0x8] sm:$0xff] }
 0x3c3   :  { %vm593_vm5 = vcmp.ge.f32.partialorder %v579_v24, 0.0  ;;  %v597_v27 = vmul.f32 0.25, %v579_v24 }
 0x3c4   :  { %vm592_vm6 = vcmp.ge.f32.partialorder %v574_v26, 0.0  ;;  %v596_v28 = vmul.f32 0.25, %v574_v26 }
 0x3c5   :  { %v3421_v29 = vsel %vm593_vm5, %v579_v24, %v597_v27  ;;  %v1103_v24 = vld [vmem:[%s3742_s13] sm:$0xff] }
 0x3c6   :  { %v3423_v30 = vsel %vm592_vm6, %v574_v26, %v596_v28  ;;  %v3520_v26 = vpack.c.bf16 %v1104_v25, %v1103_v24  ;;  %vm1210_vm6 = vcmask 523264  }
 0x3c7   :  { %v2831_v31 = vpop.f32.mrb[8].mxu0  ;;  %v3025_v32 = vpack.c.bf16 %v3421_v29, %v3423_v30 }
 0x3c8   :  { %v589_v33 = vadd.f32 %v2831_v31, %v2608_v22  ;;  %v583_v34 = vpop.f32.mrb[9].mxu0 }
 0x3c9   :  { %v584_v35 = vadd.f32 %v2608_v22, %v583_v34  ;;  %3026 = vmatprep.subr.bf16.mxu1 %v3025_v32  ;;  %v3069_v22 = vpack.c.bf16 %v989_v20, %v988_v19 }
 0x3ca   :  { %vm595_vm7 = vcmp.ge.f32.partialorder %v589_v33, 0.0  ;;  %v599_v36 = vmul.f32 0.25, %v589_v33  ;;  %3028 = vmatpush3.bf16.msra.mxu1 %v3025_v32 }
 0x3cb   :  { %vm594_vm8 = vcmp.ge.f32.partialorder %v584_v35, 0.0  ;;  %v598_v37 = vmul.f32 0.25, %v584_v35 }
 0x3cc   :  { %v3427_v38 = vsel %vm595_vm7, %v589_v33, %v599_v36  ;;  %vm1318_vm7 = vcmask 125952  }
 0x3cd   :  { %v3429_v39 = vsel %vm594_vm8, %v584_v35, %v598_v37 }
 0x3ce   :  { %v3029_v40 = vpack.c.bf16 %v3427_v38, %v3429_v39 }
 0x3d0   :  { %3030 = vmatprep.subr.bf16.mxu1 %v3029_v40 }
 0x3d1   :  { %3032 = vmatpush3.bf16.msra.mxu1 %v3029_v40 }
 0x3d2   :  { %3046 = vmatprep.subr.bf16.mxu1 %v3045_v44 }
 0x3d4   :  { %2841 = vmatmul.mubr.msk.f32.vlgmr.msra.gmra.mrb[6].mxu1 %vm100_vm2, %v605_v41 }
 0x3d5   :  { %3048 = vmatpush3.bf16.msra.mxu1 %v3045_v44 }
 0x3d6   :  { %3050 = vmatprep.subr.bf16.mxu1 %v3049_v49 }
 0x3d9   :  { %3052 = vmatpush3.bf16.msra.mxu1 %v3049_v49 }
 0x3da   :  { %3054 = vmatprep.subr.bf16.mxu1 %v3053_v52 }
 0x3dd   :  { %3056 = vmatpush3.bf16.msra.mxu1 %v3053_v52 }
 0x3de   :  { %2901 = vmatprep.subr.mxu1 %v1105_v23 }
 0x4a7   :  { %v2842_v45 = vpop.f32.mrb[6].mxu1 }
 0x4a8   :  { %v678_v46 = vpop.f32.mrb[7].mxu1 }
 0x4a9   :  { %2855 = vmatprep.mubr.msk.f32.mxu0 %vm700_vm9, %v678_v46 }
 0x4aa   :  { %2856 = vmatmul.mubr.msk.f32.vlgmr.msra.gmra.mrb[10].mxu0 %vm700_vm9, %v2842_v45 }
 0x4ab   :  { %2877 = vmatprep.mubr.msk.f32.mxu0 %vm886_vm12, %v882_v62 }
 0x57d   :  { %v2857_v54 = vpop.f32.mrb[10].mxu0 }
 0x57e   :  { %v779_v55 = vadd.f32 %v2857_v54, %v2615_v53  ;;  %v773_v56 = vpop.f32.mrb[11].mxu0 }
 0x57f   :  { %v774_v57 = vadd.f32 %v2615_v53, %v773_v56 }
 0x580   :  { %v785_v58 = vmul.f32 0.25, %v779_v55  ;;  %vm783_vm10 = vcmp.ge.f32.partialorder %v779_v55, 0.0 }
 0x581   :  { %vm782_vm11 = vcmp.ge.f32.partialorder %v774_v57, 0.0  ;;  %v784_v59 = vmul.f32 0.25, %v774_v57 }
 0x582   :  { %v787_v61 = vsel %vm783_vm10, %v779_v55, %v785_v58 }
 0x583   :  { %v786_v60 = vsel %vm782_vm11, %v774_v57, %v784_v59 }
 0x584   :  { %2870 = vmatprep.mubr.msk.f32.mxu1 %vm700_vm9, %v786_v60 }
 0x585   :  { %2871 = vmatmul.mubr.msk.f32.vlgmr.msra.gmra.mrb[8].mxu1 %vm700_vm9, %v787_v61 }
 0x586   :  { %2902 = vmatpush3.msra.mxu1 %v1105_v23 }
 0x587   :  { %3073 = vmatprep.subr.bf16.mxu1 %v3200_v16 }
 0x658   :  { %v2872_v2 = vpop.f32.mrb[8].mxu1 }
 0x659   :  { %v879_v3 = vadd.f32 %v2872_v2, %v2618_v63  ;;  %v873_v4 = vpop.f32.mrb[9].mxu1 }
 0x65a   :  { %v874_v8 = vadd.f32 %v2618_v63, %v873_v4 }
 0x65c   :  { %v3057_v10 = vpack.c.bf16 %v879_v3, %v874_v8 }
 0x65e   :  { %3058 = vmatprep.subr.bf16.mxu0 %v3057_v10 }
 0x65f   :  { %3060 = vmatpush3.bf16.msra.mxu0 %v3057_v10 }
 0x660   :  { %3062 = vmatprep.subr.bf16.mxu0 %v3061_v11 }
 0x662   :  { %2878 = vmatmul.mubr.msk.f32.vlgmr.msra.gmra.mrb[12].mxu0 %vm886_vm12, %v883_v14 }
 0x663   :  { %3064 = vmatpush3.bf16.msra.mxu0 %v3061_v11  ;;  %2880 = vmatprep.mubr.msk.f32.mxu0 %vm886_vm12, %v884_v15 }
 0x664   :  { %3066 = vmatprep.subr.bf16.mxu0 %v3065_v18 }
 0x666   :  { %2881 = vmatmul.mubr.msk.f32.gmra.mrb[14].mxu0 %vm886_vm12, %v885_v21 }
 0x667   :  { %3068 = vmatpush3.bf16.msra.mxu0 %v3065_v18  ;;  %2895 = vmatprep.mubr.msk.f32.mxu0 %vm700_vm9, %v3423_v30 }
 0x668   :  { %3070 = vmatprep.subr.bf16.mxu0 %v3069_v22 }
 0x66b   :  { %3072 = vmatpush3.bf16.msra.mxu0 %v3069_v22 }
 0x66c   :  { %3082 = vmatprep.subr.bf16.mxu0 %v3200_v16 }
 0x66e   :  { %2896 = vmatmul.mubr.msk.f32.vlgmr.msra.gmra.mrb[12].mxu0 %vm700_vm9, %v3421_v29 }
 0x66f   :  { %2898 = vmatprep.mubr.msk.f32.mxu0 %vm700_vm9, %v3429_v39  ;;  %3084 = vmatpush3.bf16.msra.mxu0 %v3520_v26 }
 0x670   :  { %3088 = vmatprep.subr.bf16.mxu0 %v3200_v16 }
 0x672   :  { %2899 = vmatmul.mubr.msk.f32.gmra.mrb[14].mxu0 %vm700_vm9, %v3427_v38 }
 0x673   :  { %2934 = vmatprep.mubr.msk.f32.mxu0 %vm3201_vm1, %v3202_v17 }
 0x741   :  { %v2897_v27 = vpop.f32.mrb[12].mxu0 }
 0x742   :  { %vm1088_vm13 = vcmp.ge.f32.partialorder %v2897_v27, 0.0  ;;  %v1092_v28 = vmul.f32 0.25, %v2897_v27  ;;  %v1068_v29 = vpop.f32.mrb[13].mxu0 }
 0x743   :  { %vm1087_vm14 = vcmp.ge.f32.partialorder %v1068_v29, 0.0  ;;  %v1091_v30 = vmul.f32 0.25, %v1068_v29 }
 0x744   :  { %v1096_v31 = vsel %vm1088_vm13, %v2897_v27, %v1092_v28 }
 0x745   :  { %v1095_v32 = vsel %vm1087_vm14, %v1068_v29, %v1091_v30  ;;  %v2900_v33 = vpop.f32.mrb[14].mxu0  ;;  %v3528_v37 = vadd.f32 %v1096_v31, %v3316_v1  ;;  %v2629_v1 = vld [vmem:[%s3743_s14] ss:$0 sm:$0xff]  ;;  %s3204_s14 = smov 96  }
 0x746   :  { %v3525_v34 = vadd.f32 %v1095_v32, %v3311_v0  ;;  %vm1090_vm15 = vcmp.ge.f32.partialorder %v2900_v33, 0.0  ;;  %v1094_v35 = vmul.f32 0.25, %v2900_v33  ;;  %v1078_v36 = vpop.f32.mrb[15].mxu0 }
 0x747   :  { %vm1089_vm5 = vcmp.ge.f32.partialorder %v1078_v36, 0.0  ;;  %v1093_v38 = vmul.f32 0.25, %v1078_v36 }
 0x748   :  { %v1098_v39 = vsel %vm1090_vm15, %v2900_v33, %v1094_v35  ;;  %2903 = vmatprep.mubr.msk.f32.mxu1 %vm71_vm0, %v3525_v34 }
 0x749   :  { %v1097_v40 = vsel %vm1089_vm5, %v1078_v36, %v1093_v38  ;;  %2904 = vmatmul.mubr.msk.f32.vlgmr.msra.gmra.mrb[10].mxu1 %vm71_vm0, %v3528_v37  ;;  %v3539_v0 = vadd.f32 %v1098_v39, %v3336_v9 }
 0x74a   :  { %v3535_v41 = vadd.f32 %v1097_v40, %v3330_v7  ;;  %3075 = vmatpush3.bf16.msra.mxu1 %v3520_v26 }
 0x74b   :  { %3076 = vmatprep.subr.bf16.mxu1 %v3200_v16 }
 0x74c   :  { %2906 = vmatprep.mubr.msk.f32.mxu1 %vm71_vm0, %v3535_v41 }
 0x74d   :  { %2907 = vmatmul.mubr.msk.f32.gmra.mrb[12].mxu1 %vm71_vm0, %v3539_v0 }
 0x74e   :  { %2913 = vmatprep.mubr.msk.f32.mxu1 %vm3201_vm1, %v3202_v17 }
 0x751   :  { %2914 = vmatmul.mubr.f32.vlgmr.msra.gmra.mrb[14].mxu1 %v3202_v17 }
 0x752   :  { %3078 = vmatpush3.bf16.msra.mxu1 %v3520_v26  ;;  %2920 = vmatprep.mubr.msk.f32.mxu1 %vm3201_vm1, %v3202_v17 }
 0x753   :  { %3079 = vmatprep.subr.bf16.mxu1 %v3200_v16 }
 0x81c   :  { %v2905_v7 = vpop.f32.mrb[10].mxu1 }
 0x81d   :  { %v1197_v9 = vadd.f32 %v2905_v7, %v2629_v1  ;;  %v1191_v42 = vpop.f32.mrb[11].mxu1 }
 0x81e   :  { %v1192_v43 = vadd.f32 %v2629_v1, %v1191_v42 }
 0x81f   :  { %1212 = vst.msk [vmem:[#allocation2 + $0x8] sm:$0xff] %vm1210_vm6, %v1197_v9 }
 0x820   :  { %1211 = vst.msk [vmem:[#allocation2] sm:$0xff] %vm1210_vm6, %v1192_v43  ;;  %v2908_v44 = vpop.f32.mrb[12].mxu1 }
 0x821   :  { %v1207_v45 = vadd.f32 %v2908_v44, %v2629_v1  ;;  %v1201_v46 = vpop.f32.mrb[13].mxu1 }
 0x822   :  { %v1202_v47 = vadd.f32 %v2629_v1, %v1201_v46 }
 0x823   :  { %1214 = vst.msk [vmem:[#allocation2 + $0x18] sm:$0xff] %vm1210_vm6, %v1207_v45 }
 0x824   :  { %1213 = vst.msk [vmem:[#allocation2 + $0x10] sm:$0xff] %vm1210_vm6, %v1202_v47  ;;  %v1285_v48 = vpop.f32.mrb[14].mxu1 }
 0x825   :  { %v2915_v49 = vpop.f32.mrb[15].mxu1 }
 0x826   :  { %v1426_v27 = vld [vmem:[#allocation2 + $0x8] sm:$0xf]  ;;  %v1531_v45 = vld [vmem:[#allocation2 + $0xc] sm:$0xf] }
 0x827   :  { %v1215_v50 = vld [vmem:[#allocation2] sm:$0xf]  ;;  %v1321_v4 = vld [vmem:[#allocation2 + $0x4] sm:$0xf] }
 0x828   :  { %v1289_v51 = vadd.f32 %v1285_v48, %v1215_v50 }
 0x82a   :  { %3129 = vtanh.f32 %v1289_v51  ;;  %v2634_v53 = vmul.f32 -1.442695, %v1289_v51 }
 0x82c   :  { %3131 = vpow2.f32 %v2634_v53 }
 0x834   :  { %v3130_v52 = vpop.eup %3129 }
 0x835   :  { %1299 = vrot.lane.b32.xlu1 %v3130_v52, %s3204_s14 }
 0x836   :  { %v3132_v54 = vpop.eup %3131 }
 0x837   :  { %v1293_v55 = vadd.f32 1.0, %v3132_v54 }
 0x839   :  { %3133 = vrcp.f32 %v1293_v55 }
 0x843   :  { %v3134_v56 = vpop.eup %3133 }
 0x844   :  { %v1297_v59 = vmul.f32 0.0, %v3134_v56 }
 0x8a7   :  { %v1300_v57 = vpop.permute.xlu1 %1299 }
 0x8a8   :  { %v1302_v58 = vmul.f32 %v3134_v56, %v1300_v57 }
 0x8aa   :  { %1304 = vrot.lane.b32.xlu0 %v1302_v58, %s3205_s20 }
 0x91c   :  { %v1305_v60 = vpop.permute.xlu0 %1304 }
 0x91d   :  { %v1307_v61 = vadd.f32 %v1305_v60, %v1297_v59 }
 0x91f   :  { %3135 = vtanh.f32 %v1307_v61 }
 0x929   :  { %v3136_v62 = vpop.eup %3135 }
 0x92a   :  { %1310 = vrot.lane.b32.xlu1 %v3136_v62, %s3206_s3 }
 0x99c   :  { %v1311_v63 = vpop.permute.xlu1 %1310 }
 0x99d   :  { %v1313_v2 = vmul.f32 %v3134_v56, %v1311_v63  ;;  %v1636_v63 = vld [vmem:[#allocation2 + $0x10] sm:$0xf] }
 0x99f   :  { %1315 = vrot.lane.b32.xlu0 %v1313_v2, %s3207_s21 }
 0xa11   :  { %v1316_v3 = vpop.permute.xlu0 %1315 }
 0xa12   :  { %1319 = vst.msk [vmem:[#allocation3] sm:$0xf] %vm1318_vm7, %v1316_v3  ;;  %2921 = vmatmul.mubr.msk.f32.vlgmr.msra.gmra.mrb[16].mxu1 %vm886_vm12, %v1316_v3 }
 0xa13   :  { %3081 = vmatpush3.bf16.msra.mxu1 %v3520_v26  ;;  %2927 = vmatprep.mubr.msk.f32.mxu1 %vm3201_vm1, %v3202_v17 }
 0xa14   :  { %3085 = vmatprep.subr.bf16.mxu1 %v3200_v16 }
 0xae5   :  { %v1390_v5 = vpop.f32.mrb[16].mxu1 }
 0xae6   :  { %v1394_v6 = vadd.f32 %v1390_v5, %v1321_v4  ;;  %v2922_v8 = vpop.f32.mrb[17].mxu1 }
 0xae8   :  { %3137 = vtanh.f32 %v1394_v6  ;;  %v2636_v11 = vmul.f32 -1.442695, %v1394_v6 }
 0xaea   :  { %3139 = vpow2.f32 %v2636_v11 }
 0xaf2   :  { %v3138_v10 = vpop.eup %3137 }
 0xaf3   :  { %1404 = vrot.lane.b32.xlu1 %v3138_v10, %s3204_s14 }
 0xaf4   :  { %v3140_v12 = vpop.eup %3139 }
 0xaf5   :  { %v1398_v13 = vadd.f32 1.0, %v3140_v12 }
 0xaf7   :  { %3141 = vrcp.f32 %v1398_v13 }
 0xb01   :  { %v3142_v14 = vpop.eup %3141 }
 0xb02   :  { %v1402_v19 = vmul.f32 %v3142_v14, %v1307_v61 }
 0xb65   :  { %v1405_v15 = vpop.permute.xlu1 %1404 }
 0xb66   :  { %v1407_v18 = vmul.f32 %v3142_v14, %v1405_v15 }
 0xb68   :  { %1409 = vrot.lane.b32.xlu0 %v1407_v18, %s3205_s20 }
 0xbda   :  { %v1410_v20 = vpop.permute.xlu0 %1409 }
 0xbdb   :  { %v1412_v21 = vadd.f32 %v1410_v20, %v1402_v19 }
 0xbdd   :  { %3143 = vtanh.f32 %v1412_v21 }
 0xbe7   :  { %v3144_v22 = vpop.eup %3143 }
 0xbe8   :  { %1415 = vrot.lane.b32.xlu1 %v3144_v22, %s3206_s3 }
 0xc5a   :  { %v1416_v23 = vpop.permute.xlu1 %1415 }
 0xc5b   :  { %v1418_v24 = vmul.f32 %v3142_v14, %v1416_v23  ;;  %v1741_v23 = vld [vmem:[#allocation2 + $0x14] sm:$0xf] }
 0xc5d   :  { %1420 = vrot.lane.b32.xlu0 %v1418_v24, %s3207_s21 }
 0xccf   :  { %v1421_v25 = vpop.permute.xlu0 %1420 }
 0xcd0   :  { %1424 = vst.msk [vmem:[#allocation3 + $0x4] sm:$0xf] %vm1318_vm7, %v1421_v25  ;;  %2928 = vmatmul.mubr.msk.f32.vlgmr.msra.gmra.mrb[18].mxu1 %vm886_vm12, %v1421_v25 }
 0xcd1   :  { %3087 = vmatpush3.bf16.msra.mxu1 %v3520_v26  ;;  %2941 = vmatprep.mubr.msk.f32.mxu1 %vm3201_vm1, %v3202_v17 }
 0xcd2   :  { %3091 = vmatprep.subr.bf16.mxu1 %v3200_v16 }
 0xda3   :  { %v1495_v28 = vpop.f32.mrb[18].mxu1 }
 0xda4   :  { %v1499_v29 = vadd.f32 %v1495_v28, %v1426_v27  ;;  %v2929_v30 = vpop.f32.mrb[19].mxu1 }
 0xda6   :  { %3145 = vtanh.f32 %v1499_v29  ;;  %v2638_v32 = vmul.f32 -1.442695, %v1499_v29 }
 0xda8   :  { %3147 = vpow2.f32 %v2638_v32 }
 0xdb0   :  { %v3146_v31 = vpop.eup %3145 }
 0xdb1   :  { %1509 = vrot.lane.b32.xlu1 %v3146_v31, %s3204_s14 }
 0xdb2   :  { %v3148_v33 = vpop.eup %3147 }
 0xdb3   :  { %v1503_v35 = vadd.f32 1.0, %v3148_v33 }
 0xdb5   :  { %3149 = vrcp.f32 %v1503_v35 }
 0xdbf   :  { %v3150_v36 = vpop.eup %3149 }
 0xdc0   :  { %v1507_v40 = vmul.f32 %v3150_v36, %v1412_v21 }
 0xe23   :  { %v1510_v38 = vpop.permute.xlu1 %1509 }
 0xe24   :  { %v1512_v39 = vmul.f32 %v3150_v36, %v1510_v38 }
 0xe26   :  { %1514 = vrot.lane.b32.xlu0 %v1512_v39, %s3205_s20 }
 0xe98   :  { %v1515_v1 = vpop.permute.xlu0 %1514 }
 0xe99   :  { %v1517_v7 = vadd.f32 %v1515_v1, %v1507_v40  ;;  %v2059_v40 = vld [vmem:[%s3744_s15] sm:$0xff]  ;;  %v2060_v1 = vld [vmem:[%s3744_s15 + $0x8] sm:$0xff] }
 0xe9b   :  { %3151 = vtanh.f32 %v1517_v7 }
 0xea5   :  { %v3152_v9 = vpop.eup %3151 }
 0xea6   :  { %1520 = vrot.lane.b32.xlu1 %v3152_v9, %s3206_s3 }
 0xf18   :  { %v1521_v42 = vpop.permute.xlu1 %1520 }
 0xf19   :  { %v1523_v43 = vmul.f32 %v3150_v36, %v1521_v42 }
 0xf1b   :  { %1525 = vrot.lane.b32.xlu0 %v1523_v43, %s3207_s21 }
 0xf8d   :  { %v1526_v44 = vpop.permute.xlu0 %1525 }
 0xf8e   :  { %1529 = vst.msk [vmem:[#allocation3 + $0x8] sm:$0xf] %vm1318_vm7, %v1526_v44  ;;  %2935 = vmatmul.mubr.msk.f32.vlgmr.msra.gmra.mrb[16].mxu0 %vm886_vm12, %v1526_v44  ;;  %v2055_v44 = vld [vmem:[#allocation3] sm:$0xff] }
 0xf8f   :  { %3090 = vmatpush3.bf16.msra.mxu0 %v3520_v26  ;;  %2948 = vmatprep.mubr.msk.f32.mxu0 %vm3201_vm1, %v3202_v17 }
 0xf90   :  { %3094 = vmatprep.subr.bf16.mxu0 %v3200_v16 }
0x1061   :  { %v1600_v46 = vpop.f32.mrb[16].mxu0 }
0x1062   :  { %v1604_v47 = vadd.f32 %v1600_v46, %v1531_v45  ;;  %v2936_v48 = vpop.f32.mrb[17].mxu0 }
0x1064   :  { %3153 = vtanh.f32 %v1604_v47  ;;  %v2640_v50 = vmul.f32 -1.442695, %v1604_v47  ;;  %v1846_v47 = vld [vmem:[#allocation2 + $0x18] sm:$0xf] }
0x1066   :  { %3155 = vpow2.f32 %v2640_v50 }
0x106e   :  { %v3154_v49 = vpop.eup %3153 }
0x106f   :  { %1614 = vrot.lane.b32.xlu1 %v3154_v49, %s3204_s14 }
0x1070   :  { %v3156_v51 = vpop.eup %3155 }
0x1071   :  { %v1608_v52 = vadd.f32 1.0, %v3156_v51 }
0x1073   :  { %3157 = vrcp.f32 %v1608_v52 }
0x107d   :  { %v3158_v53 = vpop.eup %3157 }
0x107e   :  { %v1612_v56 = vmul.f32 %v3158_v53, %v1517_v7  ;;  %v3097_v7 = vpack.c.bf16 %v2060_v1, %v2059_v40 }
0x10e1   :  { %v1615_v54 = vpop.permute.xlu1 %1614 }
0x10e2   :  { %v1617_v55 = vmul.f32 %v3158_v53, %v1615_v54 }
0x10e4   :  { %1619 = vrot.lane.b32.xlu0 %v1617_v55, %s3205_s20 }
0x1156   :  { %v1620_v57 = vpop.permute.xlu0 %1619 }
0x1157   :  { %v1622_v58 = vadd.f32 %v1620_v57, %v1612_v56 }
0x1159   :  { %3159 = vtanh.f32 %v1622_v58 }
0x1163   :  { %v3160_v59 = vpop.eup %3159 }
0x1164   :  { %1625 = vrot.lane.b32.xlu1 %v3160_v59, %s3206_s3 }
0x11d6   :  { %v1626_v60 = vpop.permute.xlu1 %1625 }
0x11d7   :  { %v1628_v61 = vmul.f32 %v3158_v53, %v1626_v60 }
0x11d9   :  { %1630 = vrot.lane.b32.xlu0 %v1628_v61, %s3207_s21 }
0x124b   :  { %v1631_v62 = vpop.permute.xlu0 %1630 }
0x124c   :  { %1634 = vst.msk [vmem:[#allocation3 + $0xc] sm:$0xf] %vm1318_vm7, %v1631_v62  ;;  %2942 = vmatmul.mubr.msk.f32.vlgmr.msra.gmra.mrb[20].mxu1 %vm886_vm12, %v1631_v62 }
0x124d   :  { %3093 = vmatpush3.bf16.msra.mxu1 %v3520_v26  ;;  %2955 = vmatprep.mubr.msk.f32.mxu1 %vm3201_vm1, %v3202_v17 }
0x124e   :  { %3098 = vmatprep.subr.bf16.mxu1 %v3097_v7 }
0x1253   :  { %v2056_v45 = vld [vmem:[#allocation3 + $0x8] sm:$0xff] }
0x131f   :  { %v1705_v2 = vpop.f32.mrb[20].mxu1 }
0x1320   :  { %v1709_v3 = vadd.f32 %v1705_v2, %v1636_v63  ;;  %v2943_v4 = vpop.f32.mrb[21].mxu1 }
0x1322   :  { %3161 = vtanh.f32 %v1709_v3  ;;  %v2642_v6 = vmul.f32 -1.442695, %v1709_v3 }
0x1324   :  { %3163 = vpow2.f32 %v2642_v6 }
0x132c   :  { %v3162_v5 = vpop.eup %3161 }
0x132d   :  { %1719 = vrot.lane.b32.xlu1 %v3162_v5, %s3204_s14  ;;  %v1951_v5 = vld [vmem:[#allocation2 + $0x1c] sm:$0xf] }
0x132e   :  { %v3164_v8 = vpop.eup %3163 }
0x132f   :  { %v1713_v10 = vadd.f32 1.0, %v3164_v8 }
0x1331   :  { %3165 = vrcp.f32 %v1713_v10 }
0x133b   :  { %v3166_v11 = vpop.eup %3165 }
0x133c   :  { %v1717_v14 = vmul.f32 %v3166_v11, %v1622_v58 }
0x139f   :  { %v1720_v12 = vpop.permute.xlu1 %1719 }
0x13a0   :  { %v1722_v13 = vmul.f32 %v3166_v11, %v1720_v12 }
0x13a2   :  { %1724 = vrot.lane.b32.xlu0 %v1722_v13, %s3205_s20 }
0x1414   :  { %v1725_v15 = vpop.permute.xlu0 %1724 }
0x1415   :  { %v1727_v18 = vadd.f32 %v1725_v15, %v1717_v14 }
0x1417   :  { %3167 = vtanh.f32 %v1727_v18 }
0x1421   :  { %v3168_v19 = vpop.eup %3167 }
0x1422   :  { %1730 = vrot.lane.b32.xlu1 %v3168_v19, %s3206_s3 }
0x1494   :  { %v1731_v20 = vpop.permute.xlu1 %1730 }
0x1495   :  { %v1733_v21 = vmul.f32 %v3166_v11, %v1731_v20 }
0x1497   :  { %1735 = vrot.lane.b32.xlu0 %v1733_v21, %s3207_s21 }
0x1509   :  { %v1736_v22 = vpop.permute.xlu0 %1735 }
0x150a   :  { %1739 = vst.msk [vmem:[#allocation3 + $0x10] sm:$0xf] %vm1318_vm7, %v1736_v22  ;;  %2949 = vmatmul.mubr.msk.f32.vlgmr.msra.gmra.mrb[18].mxu0 %vm886_vm12, %v1736_v22 }
0x150b   :  { %3096 = vmatpush3.bf16.msra.mxu0 %v3520_v26  ;;  %2962 = vmatprep.mubr.msk.f32.mxu0 %vm3201_vm1, %v3202_v17 }
0x150c   :  { %3101 = vmatprep.subr.bf16.mxu0 %v3200_v16 }
0x15dd   :  { %v1810_v24 = vpop.f32.mrb[18].mxu0 }
0x15de   :  { %v1814_v25 = vadd.f32 %v1810_v24, %v1741_v23  ;;  %v2950_v27 = vpop.f32.mrb[19].mxu0  ;;  %v2649_v24 = vld [vmem:[%s3745_s16] ss:$0 sm:$0xff] }
0x15e0   :  { %3169 = vtanh.f32 %v1814_v25  ;;  %v2644_v29 = vmul.f32 -1.442695, %v1814_v25 }
0x15e2   :  { %3171 = vpow2.f32 %v2644_v29 }
0x15ea   :  { %v3170_v28 = vpop.eup %3169 }
0x15eb   :  { %1824 = vrot.lane.b32.xlu1 %v3170_v28, %s3204_s14 }
0x15ec   :  { %v3172_v30 = vpop.eup %3171 }
0x15ed   :  { %v1818_v31 = vadd.f32 1.0, %v3172_v30 }
0x15ef   :  { %3173 = vrcp.f32 %v1818_v31 }
0x15f9   :  { %v3174_v32 = vpop.eup %3173 }
0x15fa   :  { %v1822_v35 = vmul.f32 %v3174_v32, %v1727_v18 }
0x165d   :  { %v1825_v26 = vpop.permute.xlu1 %1824 }
0x165e   :  { %v1827_v33 = vmul.f32 %v3174_v32, %v1825_v26 }
0x1660   :  { %1829 = vrot.lane.b32.xlu0 %v1827_v33, %s3205_s20 }
0x16d2   :  { %v1830_v36 = vpop.permute.xlu0 %1829 }
0x16d3   :  { %v1832_v38 = vadd.f32 %v1830_v36, %v1822_v35 }
0x16d5   :  { %3175 = vtanh.f32 %v1832_v38 }
0x16df   :  { %v3176_v39 = vpop.eup %3175 }
0x16e0   :  { %1835 = vrot.lane.b32.xlu1 %v3176_v39, %s3206_s3 }
0x1752   :  { %v1836_v9 = vpop.permute.xlu1 %1835 }
0x1753   :  { %v1838_v42 = vmul.f32 %v3174_v32, %v1836_v9 }
0x1755   :  { %1840 = vrot.lane.b32.xlu0 %v1838_v42, %s3207_s21 }
0x17c7   :  { %v1841_v43 = vpop.permute.xlu0 %1840 }
0x17c8   :  { %1844 = vst.msk [vmem:[#allocation3 + $0x14] sm:$0xf] %vm1318_vm7, %v1841_v43  ;;  %2956 = vmatmul.mubr.msk.f32.vlgmr.msra.gmra.mrb[22].mxu1 %vm886_vm12, %v1841_v43 }
0x17c9   :  { %3100 = vmatpush3.bf16.msra.mxu1 %v3097_v7  ;;  %2969 = vmatprep.mubr.msk.f32.mxu1 %vm886_vm12, %v2055_v44 }
0x17ca   :  { %3107 = vmatprep.subr.bf16.mxu1 %v3200_v16 }
0x17cc   :  { %2970 = vmatmul.mubr.msk.f32.vlgmr.msra.gmra.mrb[24].mxu1 %vm886_vm12, %v2056_v45 }
0x17cf   :  { %v2057_v46 = vld [vmem:[#allocation3 + $0x10] sm:$0xff] }
0x17d0   :  { %2972 = vmatprep.mubr.msk.f32.mxu1 %vm886_vm12, %v2057_v46 }
0x189b   :  { %v1915_v48 = vpop.f32.mrb[22].mxu1 }
0x189c   :  { %v1919_v49 = vadd.f32 %v1915_v48, %v1846_v47  ;;  %v2957_v50 = vpop.f32.mrb[23].mxu1 }
0x189e   :  { %3177 = vtanh.f32 %v1919_v49  ;;  %v2646_v54 = vmul.f32 -1.442695, %v1919_v49 }
0x189f   :  { %v2971_v51 = vpop.f32.mrb[24].mxu1 }
0x18a0   :  { %v2146_v52 = vpop.f32.mrb[25].mxu1  ;;  %3179 = vpow2.f32 %v2646_v54  ;;  %v3635_v25 = vadd.f32 %v2971_v51, %v2649_v24 }
0x18a1   :  { %v3637_v27 = vadd.f32 %v2649_v24, %v2146_v52 }
0x18a2   :  { %v2178_v29 = vmul.f32 %v3635_v25, %v3635_v25  ;;  %v2168_v26 = vsel %vm71_vm0, %v3635_v25, 0.0 }
0x18a3   :  { %v2165_v28 = vsel %vm71_vm0, %v3637_v27, 0.0  ;;  %v2177_v33 = vmul.f32 %v3637_v27, %v3637_v27 }
0x18a4   :  { %v2184_v30 = vsel %vm71_vm0, %v2178_v29, 0.0 }
0x18a5   :  { %v2181_v35 = vsel %vm71_vm0, %v2177_v33, 0.0  ;;  %v2667_v33 = vld [vmem:[%s3747_s18] ss:$0 sm:$0xff] }
0x18a8   :  { %v3178_v53 = vpop.eup %3177 }
0x18a9   :  { %1929 = vrot.lane.b32.xlu1 %v3178_v53, %s3204_s14 }
0x18aa   :  { %v3180_v55 = vpop.eup %3179 }
0x18ab   :  { %v1923_v56 = vadd.f32 1.0, %v3180_v55 }
0x18ad   :  { %3181 = vrcp.f32 %v1923_v56 }
0x18b7   :  { %v3182_v57 = vpop.eup %3181 }
0x18b8   :  { %v1927_v60 = vmul.f32 %v3182_v57, %v1832_v38 }
0x191b   :  { %v1930_v58 = vpop.permute.xlu1 %1929 }
0x191c   :  { %v1932_v59 = vmul.f32 %v3182_v57, %v1930_v58  ;;  %v3196_v58 = vld [vmem:[%s3758_s29] sm:$0xff] }
0x191e   :  { %1934 = vrot.lane.b32.xlu0 %v1932_v59, %s3205_s20 }
0x1990   :  { %v1935_v61 = vpop.permute.xlu0 %1934 }
0x1991   :  { %v1937_v62 = vadd.f32 %v1935_v61, %v1927_v60 }
0x1993   :  { %3183 = vtanh.f32 %v1937_v62 }
0x199d   :  { %v3184_v63 = vpop.eup %3183 }
0x199e   :  { %1940 = vrot.lane.b32.xlu1 %v3184_v63, %s3206_s3 }
0x1a10   :  { %v1941_v2 = vpop.permute.xlu1 %1940 }
0x1a11   :  { %v1943_v3 = vmul.f32 %v3182_v57, %v1941_v2  ;;  %v3195_v57 = vld [vmem:[%s3757_s26] sm:$0xf]  ;;  %v3198_v2 = vld [vmem:[%s3758_s29 + $0x10] sm:$0xff] }
0x1a13   :  { %1945 = vrot.lane.b32.xlu0 %v1943_v3, %s3207_s21 }
0x1a85   :  { %v1946_v4 = vpop.permute.xlu0 %1945 }
0x1a86   :  { %1949 = vst.msk [vmem:[#allocation3 + $0x18] sm:$0xf] %vm1318_vm7, %v1946_v4  ;;  %2963 = vmatmul.mubr.msk.f32.vlgmr.msra.gmra.mrb[20].mxu0 %vm886_vm12, %v1946_v4 }
0x1a87   :  { %2983 = vmatprep.mubr.msk.f32.mxu0 %vm3201_vm1, %v3202_v17 }
0x1b59   :  { %v2020_v6 = vpop.f32.mrb[20].mxu0 }
0x1b5a   :  { %v2024_v8 = vadd.f32 %v2020_v6, %v1951_v5  ;;  %v2964_v10 = vpop.f32.mrb[21].mxu0  ;;  %v3199_v6 = vld [vmem:[%s3758_s29 + $0x18] sm:$0xff] }
0x1b5c   :  { %3185 = vtanh.f32 %v2024_v8  ;;  %v2648_v12 = vmul.f32 -1.442695, %v2024_v8 }
0x1b5e   :  { %3187 = vpow2.f32 %v2648_v12 }
0x1b66   :  { %v3186_v11 = vpop.eup %3185 }
0x1b67   :  { %2034 = vrot.lane.b32.xlu1 %v3186_v11, %s3204_s14 }
0x1b68   :  { %v3188_v13 = vpop.eup %3187 }
0x1b69   :  { %v2028_v14 = vadd.f32 1.0, %v3188_v13 }
0x1b6b   :  { %3189 = vrcp.f32 %v2028_v14 }
0x1b75   :  { %v3190_v15 = vpop.eup %3189 }
0x1b76   :  { %v2032_v20 = vmul.f32 %v3190_v15, %v1937_v62  ;;  %v3197_v62 = vld [vmem:[%s3758_s29 + $0x8] sm:$0xff] }
0x1bd9   :  { %v2035_v18 = vpop.permute.xlu1 %2034 }
0x1bda   :  { %v2037_v19 = vmul.f32 %v3190_v15, %v2035_v18 }
0x1bdc   :  { %2039 = vrot.lane.b32.xlu0 %v2037_v19, %s3205_s20 }
0x1c4e   :  { %v2040_v21 = vpop.permute.xlu0 %2039 }
0x1c4f   :  { %v2042_v22 = vadd.f32 %v2040_v21, %v2032_v20 }
0x1c51   :  { %3191 = vtanh.f32 %v2042_v22 }
0x1c5b   :  { %v3192_v23 = vpop.eup %3191 }
0x1c5c   :  { %2045 = vrot.lane.b32.xlu1 %v3192_v23, %s3206_s3 }
0x1c80   :  { %2166 = vadd.xlane.f32.xlu1 %v2165_v28 }
0x1c84   :  { %2185 = vadd.xlane.f32.xlu1 %v2184_v30  ;;  %v2666_v30 = vld [vmem:[%s3746_s17] ss:$0 sm:$0xff] }
0x1cce   :  { %v2046_v31 = vpop.permute.xlu1 %2045 }
0x1ccf   :  { %v2048_v32 = vmul.f32 %v3190_v15, %v2046_v31 }
0x1cd1   :  { %2050 = vrot.lane.b32.xlu0 %v2048_v32, %s3207_s21 }
0x1cf0   :  { %2169 = vadd.xlane.f32.xlu0 %v2168_v26 }
0x1cf4   :  { %2182 = vadd.xlane.f32.xlu0 %v2181_v35 }
0x1d0d   :  { %v2167_v39 = vpop.xlane.xlu1 %2166 }
0x1d11   :  { %v2186_v7 = vpop.xlane.xlu1 %2185 }
0x1d43   :  { %v2051_v36 = vpop.permute.xlu0 %2050 }
0x1d44   :  { %2054 = vst.msk [vmem:[#allocation3 + $0x1c] sm:$0xf] %vm1318_vm7, %v2051_v36 }
0x1d4b   :  { %v2058_v38 = vld [vmem:[#allocation3 + $0x18] sm:$0xff] }
0x1d4c   :  { %2973 = vmatmul.mubr.msk.f32.gmra.mrb[26].mxu1 %vm886_vm12, %v2058_v38 }
0x1d4d   :  { %2994 = vmatprep.mubr.msk.f32.mxu1 %vm3201_vm1, %v3202_v17 }
0x1d7d   :  { %v2170_v40 = vpop.xlane.xlu0 %2169 }
0x1d7e   :  { %v3102_v1 = vpack.c.bf16 %v2170_v40, %v2167_v39 }
0x1d80   :  { %3103 = vmatpush3.bf16.msra.mxu0 %v3102_v1 }
0x1d81   :  { %v2183_v9 = vpop.xlane.xlu0 %2182  ;;  %3104 = vmatprep.subr.bf16.mxu0 %v3200_v16 }
0x1d82   :  { %v3108_v42 = vpack.c.bf16 %v2186_v7, %v2183_v9 }
0x1d84   :  { %3109 = vmatpush3.bf16.msra.mxu1 %v3108_v42 }
0x1d85   :  { %3110 = vmatprep.subr.bf16.mxu1 %v3200_v16 }
0x1e1f   :  { %v2974_v43 = vpop.f32.mrb[26].mxu1 }
0x1e20   :  { %v3656_v44 = vadd.f32 %v2974_v43, %v2649_v24  ;;  %v2156_v45 = vpop.f32.mrb[27].mxu1 }
0x1e21   :  { %v3658_v46 = vadd.f32 %v2649_v24, %v2156_v45 }
0x1e22   :  { %v2174_v17 = vsel %vm71_vm0, %v3656_v44, 0.0  ;;  %v2180_v47 = vmul.f32 %v3656_v44, %v3656_v44 }
0x1e23   :  { %2175 = vadd.xlane.f32.xlu1 %v2174_v17  ;;  %v2171_v48 = vsel %vm71_vm0, %v3658_v46, 0.0  ;;  %v2179_v49 = vmul.f32 %v3658_v46, %v3658_v46 }
0x1e24   :  { %2172 = vadd.xlane.f32.xlu0 %v2171_v48  ;;  %v2190_v16 = vsel %vm71_vm0, %v2180_v47, 0.0 }
0x1e25   :  { %v2187_v50 = vsel %vm71_vm0, %v2179_v49, 0.0 }
0x1e27   :  { %2191 = vadd.xlane.f32.xlu1 %v2190_v16 }
0x1e28   :  { %2188 = vadd.xlane.f32.xlu0 %v2187_v50 }
0x1eb0   :  { %v2176_v51 = vpop.xlane.xlu1 %2175 }
0x1eb1   :  { %v2173_v52 = vpop.xlane.xlu0 %2172 }
0x1eb2   :  { %v3105_v53 = vpack.c.bf16 %v2176_v51, %v2173_v52 }
0x1eb4   :  { %v2192_v54 = vpop.xlane.xlu1 %2191  ;;  %3106 = vmatpush3.bf16.msra.mxu0 %v3105_v53 }
0x1eb5   :  { %v2189_v55 = vpop.xlane.xlu0 %2188 }
0x1eb6   :  { %v3111_v56 = vpack.c.bf16 %v2192_v54, %v2189_v55 }
0x1eb7   :  { %2984 = vmatmul.mubr.msk.f32.vlgmr.msra.gmra.mrb[22].mxu0 %vm100_vm2, %v3195_v57 }
0x1eb8   :  { %3112 = vmatpush3.bf16.msra.mxu1 %v3111_v56  ;;  %2999 = vmatprep.mubr.msk.f32.mxu0 %vm249_vm3, %v3196_v58 }
0x1ebb   :  { %2995 = vmatmul.mubr.msk.f32.vlgmr.msra.gmra.mrb[28].mxu1 %vm100_vm2, %v3195_v57 }
0x1ebc   :  { %3007 = vmatprep.mubr.msk.f32.mxu1 %vm249_vm3, %v3196_v58 }
0x1f8a   :  { %v2259_v59 = vpop.f32.mrb[22].mxu0 }
0x1f8b   :  { %2997 = vmatprep.subr.msk.mxu0 %vm262_vm4, %v2259_v59  ;;  %v2985_v60 = vpop.f32.mrb[23].mxu0  ;;  %v2333_v61 = vmul.f32 %v2259_v59, %v2259_v59 }
0x1f8c   :  { %2998 = vmatpush3.msk.msra.mxu0 %vm262_vm4, %v2259_v59 }
0x1f8d   :  { %3000 = vmatmul.mubr.msk.f32.vlgmr.msra.gmra.mrb[24].mxu0 %vm249_vm3, %v3197_v62 }
0x1f8e   :  { %v2329_v63 = vpop.f32.mrb[28].mxu1  ;;  %3002 = vmatprep.mubr.msk.f32.mxu0 %vm249_vm3, %v3198_v2 }
0x1f8f   :  { %v2334_v3 = vsub.f32 %v2329_v63, %v2333_v61  ;;  %v2996_v4 = vpop.f32.mrb[29].mxu1 }
0x1f91   :  { %v2335_v5 = vmax.f32 %v2334_v3, 0.0  ;;  %3003 = vmatmul.mubr.msk.f32.gmra.mrb[26].mxu0 %vm249_vm3, %v3199_v6 }
0x1f93   :  { %v2336_v8 = vadd.f32 1e-05, %v2335_v5 }
0x1f95   :  { %3193 = vrsqrt.f32 %v2336_v8 }
0x1f9f   :  { %v3194_v10 = vpop.eup %3193 }
0x1fa0   :  { %3005 = vmatprep.subr.msk.mxu1 %vm262_vm4, %v3194_v10 }
0x1fa1   :  { %3006 = vmatpush3.msk.msra.mxu1 %vm262_vm4, %v3194_v10 }
0x1fa2   :  { %3008 = vmatmul.mubr.msk.f32.vlgmr.msra.gmra.mrb[30].mxu1 %vm249_vm3, %v3197_v62 }
0x1fa3   :  { %3010 = vmatprep.mubr.msk.f32.mxu1 %vm249_vm3, %v3198_v2 }
0x1fa6   :  { %3011 = vmatmul.mubr.msk.f32.gmra.mrb[32].mxu1 %vm249_vm3, %v3199_v6 }
0x2060   :  { %v3001_v11 = vpop.f32.mrb[24].mxu0 }
0x2061   :  { %2521 = vperm.xlu1 %3126, %v3001_v11   ;;  %v2407_v12 = vpop.f32.mrb[25].mxu0 }
0x2062   :  { %2516 = vperm.xlu0 %3125, %v2407_v12  }
0x2064   :  { %v3004_v13 = vpop.f32.mrb[26].mxu0 }
0x2065   :  { %v2417_v14 = vpop.f32.mrb[27].mxu0 }
0x2066   :  { %2531 = vperm.xlu0 %3125, %v3004_v13   ;;  %2526 = vperm.xlu1 %3126, %v2417_v14  }
0x2075   :  { %v3009_v15 = vpop.f32.mrb[30].mxu1 }
0x2076   :  { %2545 = vperm.xlu0 %3125, %v3009_v15   ;;  %v2495_v18 = vpop.f32.mrb[31].mxu1 }
0x2077   :  { %2540 = vperm.xlu1 %3126, %v2495_v18  }
0x2079   :  { %v3012_v19 = vpop.f32.mrb[32].mxu1 }
0x207a   :  { %2555 = vperm.xlu0 %3125, %v3012_v19   ;;  %v2505_v20 = vpop.f32.mrb[33].mxu1 }
0x207b   :  { %2550 = vperm.xlu1 %3126, %v2505_v20  }
0x20e0   :  { %v2522_v22 = vpop.permute.xlu1 %2521 }
0x20e1   :  { %v2517_v21 = vpop.permute.xlu0 %2516  ;;  %v2535_v28 = vsub.f32 %v3635_v25, %v2522_v22 }
0x20e2   :  { %v2534_v29 = vsub.f32 %v3637_v27, %v2517_v21 }
0x20e5   :  { %v2532_v23 = vpop.permute.xlu0 %2531  ;;  %v2527_v24 = vpop.permute.xlu1 %2526 }
0x20e6   :  { %v2537_v36 = vsub.f32 %v3656_v44, %v2532_v23  ;;  %v2536_v39 = vsub.f32 %v3658_v46, %v2527_v24 }
0x20f5   :  { %v2546_v31 = vpop.permute.xlu0 %2545 }
0x20f6   :  { %v2559_v32 = vmul.f32 %v2546_v31, %v2535_v28  ;;  %v2541_v26 = vpop.permute.xlu1 %2540 }
0x20f7   :  { %v2558_v35 = vmul.f32 %v2541_v26, %v2534_v29 }
0x20f8   :  { %v2570_v38 = vmul.f32 %v2666_v30, %v2559_v32 }
0x20f9   :  { %v2569_v25 = vmul.f32 %v2666_v30, %v2558_v35  ;;  %v2556_v40 = vpop.permute.xlu0 %2555 }
0x20fa   :  { %v2581_v27 = vadd.f32 %v2667_v33, %v2570_v38  ;;  %v2561_v1 = vmul.f32 %v2556_v40, %v2537_v36  ;;  %v2551_v7 = vpop.permute.xlu1 %2550 }
0x20fb   :  { %v2580_v9 = vadd.f32 %v2667_v33, %v2569_v25  ;;  %v2560_v42 = vmul.f32 %v2551_v7, %v2536_v39 }
0x20fc   :  { %v2585_v43 = vadd.f32 %v2581_v27, %v3528_v37  ;;  %v2572_v45 = vmul.f32 %v2666_v30, %v2561_v1 }
0x20fd   :  { %v2584_v17 = vadd.f32 %v2580_v9, %v3525_v34  ;;  %v2571_v47 = vmul.f32 %v2666_v30, %v2560_v42 }
0x20fe   :  { %2589 = vst.msk [vmem:[%s3748_s19 + $0x8] sm:$0xff] %vm71_vm0, %v2585_v43  ;;  %v2583_v44 = vadd.f32 %v2667_v33, %v2572_v45 }
0x20ff   :  { %2588 = vst.msk [vmem:[%s3748_s19] sm:$0xff] %vm71_vm0, %v2584_v17  ;;  %v2582_v46 = vadd.f32 %v2667_v33, %v2571_v47 }
0x2100   :  { %v2587_v48 = vadd.f32 %v2583_v44, %v3539_v0 }
0x2101   :  { %v2586_v37 = vadd.f32 %v2582_v46, %v3535_v41 }
0x2102   :  { %2591 = vst.msk [vmem:[%s3748_s19 + $0x18] sm:$0xff] %vm71_vm0, %v2587_v48 }
0x2103   :  { %2590 = vst.msk [vmem:[%s3748_s19 + $0x10] sm:$0xff] %vm71_vm0, %v2586_v37 }

</bundles_post_ra>
